<compile_context>
chip_gen: v6e
topology: v6e:2x2x1
jax: 0.10.0
libtpu: 0.0.40
codegen_flags: <defaults>
</compile_context>

<pallas_src>
import math
import functools

import jax
import jax.numpy as jnp
from jax.experimental import pallas as pl
from jax.experimental.pallas import tpu as pltpu


def _round_up(x, m):
    return ((x + m - 1) // m) * m


def _vmem_capacity_bytes():
    # Per-core VMEM (v5e/v6e: 128 MiB, v7x: 64 MiB); fall back if unavailable.
    try:
        return int(pltpu.get_tpu_info().vmem_capacity_bytes)
    except Exception:
        return 128 * 1024 * 1024


def _equal_conv2d_kernel(x_ref, w_ref, b_ref, o_ref, *, ke, toh, owp, cf, toc):
    """One (batch, oc-tile, row-tile) grid step.

    x_ref: (Hf, Wf, Cf)    whole folded padded image of one batch element;
                           its block index ignores the oc/row axes, so it
                           stays VMEM-resident (HBM read once per batch).
    w_ref: (Kd, TOC)       scaled weight tile, rows ordered (qi, qj, cf).
    b_ref: (1, TOC)        f32 bias tile.
    o_ref: (toh, owp, TOC) output tile (lane-dense channels).
    """
    j = pl.program_id(2)                       # output-row tile (innermost)
    row0 = pl.multiple_of(j * toh, toh)

    # Fused im2col: Ke*Ke unit-stride ref slices concatenated along the
    # contraction axis -> one (M, Kd) x (Kd, TOC) MXU matmul.
    taps = []
    for qi in range(ke):
        for qj in range(ke):
            taps.append(x_ref[pl.ds(row0 + qi, toh), pl.ds(qj, owp), :])
    slab = taps[0] if len(taps) == 1 else jnp.concatenate(taps, axis=-1)
    m = toh * owp
    slab = slab.reshape(m, ke * ke * cf)

    acc = jnp.dot(slab, w_ref[...], preferred_element_type=jnp.float32)
    acc = acc + b_ref[...]                     # broadcast (1, TOC)
    o_ref[...] = acc.reshape(toh, owp, toc).astype(o_ref.dtype)


def equal_conv2d(x, weight, bias, *, stride=1, padding=0):
    """Equalized conv2d, semantics of F.conv2d(input, weight*scale, bias, ...).

    x:      (N, C, H, W)   NCHW
    weight: (OC, C, K, K)  OIHW (unscaled; 1/sqrt(C*K*K) folded in here)
    bias:   (OC,) or None
    """
    N, C, H, W = x.shape
    OC, Cw, KH, KW = weight.shape
    assert Cw == C and KH == KW, "expect matching channels and square kernel"
    K = KH
    s = int(stride)
    scale = 1.0 / math.sqrt(C * K * K)

    OH = (H + 2 * padding - K) // s + 1
    OW = (W + 2 * padding - K) // s + 1

    # Compute dtype: never upcast bf16; everything else -> f32.  Accumulation
    # is always f32 via preferred_element_type.
    cdtype = x.dtype
    if cdtype not in (jnp.dtype(jnp.bfloat16), jnp.dtype(jnp.float32)):
        cdtype = jnp.dtype(jnp.float32)
    out_dtype = x.dtype
    isz = jnp.dtype(cdtype).itemsize
    osz = jnp.dtype(out_dtype).itemsize

    # ---- tiling -------------------------------------------------------------
    vmem_cap = int(_vmem_capacity_bytes() * 0.85)   # leave compiler headroom

    OCp = _round_up(OC, 128)
    TOC = 256 if OCp % 256 == 0 else 128            # MXU-width OC tile

    # Output width rounded to the output dtype's packed sublane tile so the
    # output stores are unmasked and dense.
    sub = 8 * max(1, 4 // osz)                      # 8 f32 / 16 bf16 / 32 int8
    OWp = _round_up(OW, sub)

    # Output-row tile: bigger matmul M on 128-MiB-VMEM chips, smaller on v7x.
    m_target = 1024 if vmem_cap >= 80 * (1 << 20) else 512
    TOH = max(1, min(OH, max(1, m_target // OWp)))
    OHp = _round_up(OH, TOH)

    # ---- space-to-depth fold (stride folded into channels) ------------------
    # The kernel always runs a stride-1 conv with an effective Ke x Ke kernel
    # over Cf = s*s*C folded channels: unit-stride taps, longer contraction.
    Ke = (K - 1) // s + 1
    Kp = Ke * s
    Cf = s * s * C
    Kd = Ke * Ke * Cf

    Hp = _round_up(max((OHp + Ke - 1) * s, H + 2 * padding), s)
    Wp = _round_up(max((OWp + Ke - 1) * s, W + 2 * padding), s)
    Hf, Wf = Hp // s, Wp // s

    # NCHW -> NHWC once, zero-pad spatially, phase-fold stride into channels.
    x_nhwc = jnp.transpose(x, (0, 2, 3, 1)).astype(cdtype)
    x_pad = jnp.pad(
        x_nhwc,
        ((0, 0),
         (padding, Hp - H - padding),
         (padding, Wp - W - padding),
         (0, 0)))
    x_fold = (x_pad.reshape(N, Hf, s, Wf, s, C)
              .transpose(0, 1, 3, 2, 4, 5)
              .reshape(N, Hf, Wf, Cf))

    # Weight: fold equalized-lr scale, apply the same phase fold, order rows
    # (qi, qj, pi, pj, c) to match the kernel's slab, pad OC to OCp.
    w = weight.astype(jnp.float32) * scale                       # (OC, C, K, K)
    w = jnp.pad(w, ((0, 0), (0, 0), (0, Kp - K), (0, Kp - K)))   # (OC, C, Kp, Kp)
    w = w.transpose(2, 3, 1, 0)                                  # (Kp, Kp, C, OC)
    w = w.reshape(Ke, s, Ke, s, C, OC).transpose(0, 2, 1, 3, 4, 5)
    w = w.reshape(Kd, OC)
    w = jnp.pad(w, ((0, 0), (0, OCp - OC))).astype(cdtype)

    if bias is None:
        b = jnp.zeros((OC,), jnp.float32)
    else:
        b = bias.astype(jnp.float32)
    b = jnp.pad(b, (0, OCp - OC)).reshape(1, OCp)

    # ---- pallas call --------------------------------------------------------
    grid = (N, OCp // TOC, OHp // TOH)

    img_block = Hf * Wf * Cf * isz
    w_block = Kd * TOC * isz
    out_block = TOH * OWp * TOC * osz
    slab_bytes = TOH * OWp * Kd * isz + TOH * OWp * TOC * 4
    need = 2 * (img_block + w_block + out_block + TOC * 4) + 3 * slab_bytes
    # TODO(synk): if `need` exceeds the cap (very large Hf*Wf*Cf vs v7x's
    # 64 MiB VMEM), switch the image to memory_space=pl.ANY with a manually
    # double-buffered (TOH + Ke - 1)-row window instead of clamping here.
    vmem_limit = int(min(max(need, 32 * (1 << 20)), vmem_cap))

    cost = pl.CostEstimate(
        flops=int(2 * N * OH * OW * K * K * C * OC),
        transcendentals=0,
        bytes_accessed=int(N * H * W * C * isz + OC * C * K * K * isz
                           + OC * 4 + N * OH * OW * OC * osz),
    )

    kernel = functools.partial(
        _equal_conv2d_kernel, ke=Ke, toh=TOH, owp=OWp, cf=Cf, toc=TOC)

    out = pl.pallas_call(
        kernel,
        out_shape=jax.ShapeDtypeStruct((N, OHp, OWp, OCp), out_dtype),
        grid_spec=pltpu.PrefetchScalarGridSpec(
            num_scalar_prefetch=0,
            grid=grid,
            in_specs=[
                # Whole folded image of batch n; index ignores (o, j), so the
                # block stays VMEM-resident across OC/row tiles and HBM is
                # read exactly once per batch element (im2col fully fused).
                pl.BlockSpec((None, Hf, Wf, Cf), lambda n, o, j: (n, 0, 0, 0)),
                # OC-tiled weight/bias, resident across the inner row tiles.
                pl.BlockSpec((Kd, TOC), lambda n, o, j: (0, o)),
                pl.BlockSpec((1, TOC), lambda n, o, j: (0, o)),
            ],
            out_specs=pl.BlockSpec((None, TOH, OWp, TOC),
                                   lambda n, o, j: (n, j, 0, o)),
        ),
        compiler_params=pltpu.CompilerParams(
            # No reduction grid axis (the full contraction happens inside one
            # grid step), so every axis is megacore-shardable; for N == 1 on
            # v7x the oc/row axes still give the compiler a split.
            dimension_semantics=("parallel", "parallel", "parallel"),
            vmem_limit_bytes=vmem_limit),
        cost_estimate=cost,
    )(x_fold, w, b)

    # Strip padding, back to NCHW (module API contract).
    out = out[:, :OH, :OW, :OC]
    return jnp.transpose(out, (0, 3, 1, 2))


if __name__ == "__main__":
    key = jax.random.PRNGKey(0)
    k_x, k_w, k_b = jax.random.split(key, 3)

    # Small shapes consistent with the module.
    N, C, H, W = 2, 4, 16, 16
    OC, K = 8, 3

    x = jax.random.normal(k_x, (N, C, H, W), dtype=jnp.float32)
    weight = jax.random.normal(k_w, (OC, C, K, K), dtype=jnp.float32)
    bias = 0.1 * jax.random.normal(k_b, (OC,), dtype=jnp.float32)

    scale = 1.0 / math.sqrt(C * K * K)

    def ref_conv(stride, padding):
        return jax.lax.conv_general_dilated(
            x, weight * scale,
            window_strides=(stride, stride),
            padding=((padding, padding), (padding, padding)),
            dimension_numbers=("NCHW", "OIHW", "NCHW"),
        ) + bias.reshape(1, OC, 1, 1)

    # stride=1, padding=1 ("same" 3x3 conv).
    out = jax.block_until_ready(equal_conv2d(x, weight, bias, stride=1, padding=1))
    ref = ref_conv(1, 1)
    assert out.shape == (N, OC, H, W), out.shape
    assert out.dtype == x.dtype, out.dtype
    err = float(jnp.max(jnp.abs(out - ref)))
    assert err < 1e-4, err

    # stride=2, padding=1 (downsampling conv; exercises the space-to-depth fold).
    out2 = jax.block_until_ready(equal_conv2d(x, weight, bias, stride=2, padding=1))
    ref2 = ref_conv(2, 1)
    assert out2.shape == ref2.shape, (out2.shape, ref2.shape)
    err2 = float(jnp.max(jnp.abs(out2 - ref2)))
    assert err2 < 1e-4, err2

    print("KERNEL_OK")
</pallas_src>

<mosaic_0001>
module attributes {stable_mosaic.version = 11 : i64} {
  func.func @_equal_conv2d_kernel(%arg0: i32, %arg1: i32, %arg2: i32, %arg3: memref<1x18x18x4xf32, #tpu.memory_space<vmem>>, %arg4: memref<36x128xf32, #tpu.memory_space<vmem>>, %arg5: memref<1x128xf32, #tpu.memory_space<vmem>>, %arg6: memref<1x16x16x128xf32, #tpu.memory_space<vmem>>) attributes {dimension_semantics = [#tpu.dimension_semantics<parallel>, #tpu.dimension_semantics<parallel>, #tpu.dimension_semantics<parallel>], iteration_bounds = array<i64: 2, 1, 1>, scalar_prefetch = 0 : i64, scratch_operands = 0 : i64, tpu.core_type = #tpu.core_type<tc>, window_params = [{transform_indices = @transform_0, window_bounds = array<i64: 1, 18, 18, 4>}, {transform_indices = @transform_1, window_bounds = array<i64: 36, 128>}, {transform_indices = @transform_2, window_bounds = array<i64: 1, 128>}, {transform_indices = @transform_3, window_bounds = array<i64: 1, 16, 16, 128>}]} {
    %c16_i32 = arith.constant 16 : i32
    %0 = arith.muli %arg2, %c16_i32 : i32
    %1 = tpu.assume_multiple %0, 16 : i32
    %c0_i32 = arith.constant 0 : i32
    %2 = arith.addi %1, %c0_i32 : i32
    %c0 = arith.constant 0 : index
    %3 = arith.index_cast %2 : i32 to index
    %c0_0 = arith.constant 0 : index
    %c0_1 = arith.constant 0 : index
    %4 = vector.load %arg3[%c0, %3, %c0_0, %c0_1] : memref<1x18x18x4xf32, #tpu.memory_space<vmem>>, vector<1x16x16x4xf32>
    %5 = vector.shape_cast %4 : vector<1x16x16x4xf32> to vector<16x16x4xf32>
    %c0_i32_2 = arith.constant 0 : i32
    %6 = arith.addi %1, %c0_i32_2 : i32
    %c0_3 = arith.constant 0 : index
    %7 = arith.index_cast %6 : i32 to index
    %c1 = arith.constant 1 : index
    %c0_4 = arith.constant 0 : index
    %8 = vector.load %arg3[%c0_3, %7, %c1, %c0_4] : memref<1x18x18x4xf32, #tpu.memory_space<vmem>>, vector<1x16x16x4xf32>
    %9 = vector.shape_cast %8 : vector<1x16x16x4xf32> to vector<16x16x4xf32>
    %c0_i32_5 = arith.constant 0 : i32
    %10 = arith.addi %1, %c0_i32_5 : i32
    %c0_6 = arith.constant 0 : index
    %11 = arith.index_cast %10 : i32 to index
    %c2 = arith.constant 2 : index
    %c0_7 = arith.constant 0 : index
    %12 = vector.load %arg3[%c0_6, %11, %c2, %c0_7] : memref<1x18x18x4xf32, #tpu.memory_space<vmem>>, vector<1x16x16x4xf32>
    %13 = vector.shape_cast %12 : vector<1x16x16x4xf32> to vector<16x16x4xf32>
    %c1_i32 = arith.constant 1 : i32
    %14 = arith.addi %1, %c1_i32 : i32
    %c0_8 = arith.constant 0 : index
    %15 = arith.index_cast %14 : i32 to index
    %c0_9 = arith.constant 0 : index
    %c0_10 = arith.constant 0 : index
    %16 = vector.load %arg3[%c0_8, %15, %c0_9, %c0_10] : memref<1x18x18x4xf32, #tpu.memory_space<vmem>>, vector<1x16x16x4xf32>
    %17 = vector.shape_cast %16 : vector<1x16x16x4xf32> to vector<16x16x4xf32>
    %c1_i32_11 = arith.constant 1 : i32
    %18 = arith.addi %1, %c1_i32_11 : i32
    %c0_12 = arith.constant 0 : index
    %19 = arith.index_cast %18 : i32 to index
    %c1_13 = arith.constant 1 : index
    %c0_14 = arith.constant 0 : index
    %20 = vector.load %arg3[%c0_12, %19, %c1_13, %c0_14] : memref<1x18x18x4xf32, #tpu.memory_space<vmem>>, vector<1x16x16x4xf32>
    %21 = vector.shape_cast %20 : vector<1x16x16x4xf32> to vector<16x16x4xf32>
    %c1_i32_15 = arith.constant 1 : i32
    %22 = arith.addi %1, %c1_i32_15 : i32
    %c0_16 = arith.constant 0 : index
    %23 = arith.index_cast %22 : i32 to index
    %c2_17 = arith.constant 2 : index
    %c0_18 = arith.constant 0 : index
    %24 = vector.load %arg3[%c0_16, %23, %c2_17, %c0_18] : memref<1x18x18x4xf32, #tpu.memory_space<vmem>>, vector<1x16x16x4xf32>
    %25 = vector.shape_cast %24 : vector<1x16x16x4xf32> to vector<16x16x4xf32>
    %c2_i32 = arith.constant 2 : i32
    %26 = arith.addi %1, %c2_i32 : i32
    %c0_19 = arith.constant 0 : index
    %27 = arith.index_cast %26 : i32 to index
    %c0_20 = arith.constant 0 : index
    %c0_21 = arith.constant 0 : index
    %28 = vector.load %arg3[%c0_19, %27, %c0_20, %c0_21] : memref<1x18x18x4xf32, #tpu.memory_space<vmem>>, vector<1x16x16x4xf32>
    %29 = vector.shape_cast %28 : vector<1x16x16x4xf32> to vector<16x16x4xf32>
    %c2_i32_22 = arith.constant 2 : i32
    %30 = arith.addi %1, %c2_i32_22 : i32
    %c0_23 = arith.constant 0 : index
    %31 = arith.index_cast %30 : i32 to index
    %c1_24 = arith.constant 1 : index
    %c0_25 = arith.constant 0 : index
    %32 = vector.load %arg3[%c0_23, %31, %c1_24, %c0_25] : memref<1x18x18x4xf32, #tpu.memory_space<vmem>>, vector<1x16x16x4xf32>
    %33 = vector.shape_cast %32 : vector<1x16x16x4xf32> to vector<16x16x4xf32>
    %c2_i32_26 = arith.constant 2 : i32
    %34 = arith.addi %1, %c2_i32_26 : i32
    %c0_27 = arith.constant 0 : index
    %35 = arith.index_cast %34 : i32 to index
    %c2_28 = arith.constant 2 : index
    %c0_29 = arith.constant 0 : index
    %36 = vector.load %arg3[%c0_27, %35, %c2_28, %c0_29] : memref<1x18x18x4xf32, #tpu.memory_space<vmem>>, vector<1x16x16x4xf32>
    %37 = vector.shape_cast %36 : vector<1x16x16x4xf32> to vector<16x16x4xf32>
    %38 = tpu.concatenate %5, %9, %13, %17, %21, %25, %29, %33, %37 in 2 : vector<16x16x4xf32>, vector<16x16x4xf32>, vector<16x16x4xf32>, vector<16x16x4xf32>, vector<16x16x4xf32>, vector<16x16x4xf32>, vector<16x16x4xf32>, vector<16x16x4xf32>, vector<16x16x4xf32> -> vector<16x16x36xf32>
    %39 = vector.shape_cast %38 : vector<16x16x36xf32> to vector<256x36xf32>
    %c0_30 = arith.constant 0 : index
    %c0_31 = arith.constant 0 : index
    %40 = vector.load %arg4[%c0_30, %c0_31] : memref<36x128xf32, #tpu.memory_space<vmem>>, vector<36x128xf32>
    %cst = arith.constant dense<0.000000e+00> : vector<256x128xf32>
    %41 = tpu.matmul %39, %40, %cst {dimension_numbers = #tpu.dot_dimension_numbers<[1], [0], [0], [1], [0, 0, 1, 1], [], []>} : vector<256x36xf32>, vector<36x128xf32>, vector<256x128xf32> -> vector<256x128xf32>
    %c0_32 = arith.constant 0 : index
    %c0_33 = arith.constant 0 : index
    %42 = vector.load %arg5[%c0_32, %c0_33] : memref<1x128xf32, #tpu.memory_space<vmem>>, vector<1x128xf32>
    %43 = vector.broadcast %42 : vector<1x128xf32> to vector<256x128xf32>
    %44 = arith.addf %41, %43 : vector<256x128xf32>
    %45 = vector.shape_cast %44 : vector<256x128xf32> to vector<16x16x128xf32>
    %c0_34 = arith.constant 0 : index
    %c0_35 = arith.constant 0 : index
    %c0_36 = arith.constant 0 : index
    %c0_37 = arith.constant 0 : index
    %46 = vector.load %arg6[%c0_34, %c0_35, %c0_36, %c0_37] : memref<1x16x16x128xf32, #tpu.memory_space<vmem>>, vector<1x16x16x128xf32>
    %47 = vector.shape_cast %46 : vector<1x16x16x128xf32> to vector<16x16x128xf32>
    %48 = vector.shape_cast %45 : vector<16x16x128xf32> to vector<1x16x16x128xf32>
    tpu.vector_store %arg6[%c0_34, %c0_35, %c0_36, %c0_37], %48 {strides = array<i32>} : memref<1x16x16x128xf32, #tpu.memory_space<vmem>>, vector<1x16x16x128xf32>,
    return
  }
  func.func @transform_0(%arg0: i32, %arg1: i32, %arg2: i32) -> (i32, i32, i32, i32) {
    %c0_i32 = arith.constant 0 : i32
    %c0_i32_0 = arith.constant 0 : i32
    %c0_i32_1 = arith.constant 0 : i32
    %c0_i32_2 = arith.constant 0 : i32
    return %arg0, %c0_i32, %c0_i32_0, %c0_i32_1 : i32, i32, i32, i32
  }
  func.func @transform_1(%arg0: i32, %arg1: i32, %arg2: i32) -> (i32, i32) {
    %c0_i32 = arith.constant 0 : i32
    %c0_i32_0 = arith.constant 0 : i32
    return %c0_i32, %arg1 : i32, i32
  }
  func.func @transform_2(%arg0: i32, %arg1: i32, %arg2: i32) -> (i32, i32) {
    %c0_i32 = arith.constant 0 : i32
    %c0_i32_0 = arith.constant 0 : i32
    return %c0_i32, %arg1 : i32, i32
  }
  func.func @transform_3(%arg0: i32, %arg1: i32, %arg2: i32) -> (i32, i32, i32, i32) {
    %c0_i32 = arith.constant 0 : i32
    %c0_i32_0 = arith.constant 0 : i32
    return %arg0, %arg2, %c0_i32, %arg1 : i32, i32, i32, i32
  }
}

</mosaic_0001>

<bundles_post_ra>
// kernel: tpu_custom_call.1
= control target key start
LH: loop header
LB: loop body
LE: loop exit
PB: predicated region body
PF: predicated region fallthrough
CT: control target
= control target key end

     0   :  { %8 = vsyncpa [#allocation3], 0  ;;  %s4403_s0 = inlined_call_operand.vmem [shape: f32[2,18,18,4], index: 0, kind: input, shape index: {}]   ;;  %s4404_s1 = inlined_call_operand.vmem [shape: f32[36,128], index: 1, kind: input, shape index: {}]   ;;  %s4405_s2 = inlined_call_operand.vmem [shape: f32[1,128], index: 2, kind: input, shape index: {}]   ;;  %s4406_s3 = inlined_call_operand.hbm [shape: f32[2,16,16,128], index: 3, kind: output, shape index: {}]  }
   0x1   :  { %10 = vsyncpa [#allocation3 + $0x1], 0  ;;  %s2830_s12 = smov 0   ;;  %s2832_s13 = smov 0  }
   0x2   :  { %s2834_s14 = smov 0   ;;  %s2836_s15 = smov 0  }
   0x3   :  { %s2838_s16 = smov 0   ;;  %s2840_s17 = smov 0  }
   0x4 LB: > { %s2311_s18 = sadd.s32 4294967295, %s2798_s17   ;;  %s2312_s19 = sadd.s32 4294967294, %s2798_s17   ;;  %s2798_s17 = sphi %s2840_s17, %s16_s17   ;;  %s2794_s16 = sphi %s2838_s16, %s4568_s16   ;;  %s2790_s15 = sphi %s2836_s15, %s4567_s15   ;;  %s2786_s14 = sphi %s2834_s14, %s4566_s14   ;;  %s2782_s13 = sphi %s2832_s13, %s4565_s13   ;;  %s2778_s12 = sphi %s2830_s12, %s4564_s12  }
   0x5   : > { %s35_s20 = sadd.s32 1, %s2794_s16  ;;  %s124_s21 = sadd.s32 1, %s2786_s14 }
   0x6   : > { %p37_p0 = scmp.ge.s32.totalorder %s35_s20, 2  ;;  %p134_p1 = scmp.ne.s32.totalorder %s2786_s14, %s2782_s13 }
   0x7   : > { %p135_p2 = scmp.eq.s32.totalorder %s2311_s18, 1  ;;  %p140_p3 = scmp.ne.s32.totalorder %s2782_s13, %s2778_s12 }
   0x8   : > { %s4570_s20 = smov (%p37_p0, %s35_s20), 0  ;;  %p141_p5 = scmp.eq.s32.totalorder %s2312_s19, 1 }
   0x9   : > { %p2870_p4 = por %p135_p2, %p134_p1  ;;  %s117_s23 = ssub.s32 %s2794_s16, %s4570_s20 }
   0xa   : > { %p2317_p6 = scmp.ge.s32.totalorder %s2798_s17, 1  ;;  %p122_p7 = scmp.eq.s32.totalorder %s117_s23, 0 }
   0xb   : > { %p2877_p8 = por %p141_p5, %p140_p3  ;;  %p180_p9 = scmp.lt.s32.totalorder %s2798_s17, 3 }
   0xc   : > { %s2883_s25 = scalar_select %p122_p7, %s2786_s14, %s124_s21  }
   0xd   : > { %p181_p10 = pnand %p2317_p6, %p180_p9 }
   0xf   : > { %184 = sbr.rel (%p181_p10) target bundleno = 863 (0x35f), region = 32 }
  0x14   : > { %p211_p11 = scmp.lt.s32.totalorder %s2790_s15, 1  ;;  %s2800_s4 = smov 4   ;;  %vm1545_vm0 = vcmask 31744   ;;  %vm1578_vm1 = vcmask 64512   ;;  %vm1918_vm2 = vcmask 1043456   ;;  %vm1611_vm3 = vcmask 97280  }
  0x15   : > { %s2801_s5 = smov 8   ;;  %s2802_s6 = smov 12   ;;  %vm1644_vm4 = vcmask 130048   ;;  %vm1677_vm5 = vcmask 162816   ;;  %vm1710_vm6 = vcmask 195584   ;;  %vm1743_vm7 = vcmask 228352  }
  0x16   : > { %s212_s26 = scalar_select %p211_p11, %s2790_s15, 1  ;;  %vm1776_vm8 = vcmask 261120   ;;  %vm1821_vm9 = vcmask 293888  }
  0x17   : > { %s2803_s7 = smov 16   ;;  %s2804_s8 = smov 20  }
  0x18   : > { %s2657_s27 = smul.u32 432, %s212_s26  ;;  %s2805_s9 = smov 24  }
  0x19   : > { %s2806_s21 = smov 28   ;;  %s2551_s11 = sshll.u32 %s2790_s15, 12 }
  0x1a   : > { %s2890_s30 = scalar_lea.vmem %s4403_s0, %s2657_s27  ;;  %s4345_s23 = scalar_lea.hbm %s4406_s3, %s2551_s11 }
  0x1b   : > { %v2893_v0 = vld [vmem:[%s2890_s30 + $0x19] sm:$0xff]  ;;  %v259_v1 = vld [vmem:[%s2890_s30 + $0x1] sm:$0xff]  ;;  %v260_v3 = vld [vmem:[%s2890_s30 + $0x9] sm:$0xff]  ;;  %s2808_s27 = smov [#allocation2]  }
  0x1c   : > { %557 = vrot.lane.b32.xlu1 %v2893_v0, %s2800_s4  ;;  %553 = vrot.lane.b32.xlu0 %v259_v1, %s2800_s4  ;;  %v2900_v2 = vld [vmem:[%s2890_s30 + $0x21] sm:$0xff]  ;;  %v2907_v4 = vld [vmem:[%s2890_s30 + $0x39] sm:$0xff]  ;;  %s2726_s28 = sshll.u32 %s2808_s27, 4  ;;  %s2727_s28 = int_to_ptr.vmem [resolvable:$false] %s2726_s28 }
  0x1d   : > { %v2910_v5 = vld [vmem:[%s2890_s30 + $0x31] sm:$0xff]  ;;  %v2920_v7 = vld [vmem:[%s2890_s30 + $0x49] sm:$0xff]  ;;  %v2930_v9 = vld [vmem:[%s2890_s30 + $0x61] sm:$0xff]  ;;  %s2728_s29 = scalar_lea.vmem %s2727_s28, 8192 }
  0x1e   : > { %v2917_v6 = vld [vmem:[%s2890_s30 + $0x51] sm:$0xff]  ;;  %v2927_v8 = vld [vmem:[%s2890_s30 + $0x69] sm:$0xff]  ;;  %v2937_v10 = vld [vmem:[%s2890_s30 + $0x81] sm:$0xff] }
  0x1f   : > { %v2940_v11 = vld [vmem:[%s2890_s30 + $0x79] sm:$0xff]  ;;  %v2950_v13 = vld [vmem:[%s2890_s30 + $0x91] sm:$0xff]  ;;  %v2960_v15 = vld [vmem:[%s2890_s30 + $0xa9] sm:$0xff] }
  0x20   : > { %559 = vrot.lane.b32.xlu1 %v2900_v2, %s2800_s4  ;;  %555 = vrot.lane.b32.xlu0 %v260_v3, %s2800_s4  ;;  %v2947_v12 = vld [vmem:[%s2890_s30 + $0x99] sm:$0xff]  ;;  %v2957_v14 = vld [vmem:[%s2890_s30 + $0xb1] sm:$0xff] }
  0x21   : > { %v276_v16 = vld [vmem:[%s2890_s30 + $0xc9] sm:$0xff]  ;;  %v2968_v17 = vld [vmem:[%s2890_s30 + $0xc1] sm:$0xff]  ;;  %v2977_v19 = vld [vmem:[%s2890_s30 + $0xd9] sm:$0xff] }
  0x22   : > { %v2974_v18 = vld [vmem:[%s2890_s30 + $0xe1] sm:$0xff]  ;;  %v2984_v20 = vld [vmem:[%s2890_s30 + $0xf9] sm:$0xff]  ;;  %v2987_v21 = vld [vmem:[%s2890_s30 + $0xf1] sm:$0xff] }
  0x23   : > { %4450 = vst [vmem:[#allocation5_spill] sm:$0xff] %v2984_v20  ;;  %4451 = vst [vmem:[#allocation6_spill] sm:$0xff] %v2987_v21  ;;  %v2994_v22 = vld [vmem:[%s2890_s30 + $0x111] sm:$0xff]  ;;  %v2997_v23 = vld [vmem:[%s2890_s30 + $0x109] sm:$0xff] }
  0x24   : > { %563 = vrot.lane.b32.xlu1 %v2907_v4, %s2800_s4  ;;  %561 = vrot.lane.b32.xlu0 %v2910_v5, %s2800_s4  ;;  %4452 = vst [vmem:[#allocation7_spill] sm:$0xff] %v2994_v22  ;;  %4453 = vst [vmem:[#allocation8_spill] sm:$0xff] %v2997_v23  ;;  %v284_v24 = vld [vmem:[%s2890_s30 + $0x129] sm:$0xff]  ;;  %v283_v25 = vld [vmem:[%s2890_s30 + $0x121] sm:$0xff] }
  0x25   : > { %v286_v26 = vld [vmem:[%s2890_s30 + $0x141] sm:$0xff]  ;;  %v285_v27 = vld [vmem:[%s2890_s30 + $0x139] sm:$0xff]  ;;  %v287_v29 = vld [vmem:[%s2890_s30 + $0x151] sm:$0xff] }
  0x26   : > { %v288_v28 = vld [vmem:[%s2890_s30 + $0x159] sm:$0xff]  ;;  %v290_v30 = vld [vmem:[%s2890_s30 + $0x171] sm:$0xff]  ;;  %v289_v31 = vld [vmem:[%s2890_s30 + $0x169] sm:$0xff] }
  0x27   : > { %v292_v32 = vld [vmem:[%s2890_s30 + $0xa] sm:$0xff]  ;;  %v291_v33 = vld [vmem:[%s2890_s30 + $0x2] sm:$0xff]  ;;  %v3027_v35 = vld [vmem:[%s2890_s30 + $0x1a] sm:$0xff] }
  0x28   : > { %567 = vrot.lane.b32.xlu1 %v2917_v6, %s2800_s4  ;;  %565 = vrot.lane.b32.xlu0 %v2920_v7, %s2800_s4  ;;  %v3024_v34 = vld [vmem:[%s2890_s30 + $0x22] sm:$0xff]  ;;  %v3034_v36 = vld [vmem:[%s2890_s30 + $0x3a] sm:$0xff] }
  0x29   : > { %4454 = vst [vmem:[#allocation9_spill] sm:$0xff] %v3034_v36  ;;  %v3037_v37 = vld [vmem:[%s2890_s30 + $0x32] sm:$0xff]  ;;  %v3047_v39 = vld [vmem:[%s2890_s30 + $0x4a] sm:$0xff]  ;;  %v3055_v41 = vld [vmem:[%s2890_s30 + $0x62] sm:$0xff] }
  0x2a   : > { %4455 = vst [vmem:[#allocation10_spill] sm:$0xff] %v3037_v37  ;;  %v3044_v38 = vld [vmem:[%s2890_s30 + $0x52] sm:$0xff]  ;;  %4457 = vst [vmem:[#allocation12_spill] sm:$0xff] %v3047_v39  ;;  %v300_v40 = vld [vmem:[%s2890_s30 + $0x6a] sm:$0xff] }
  0x2b   : > { %4456 = vst [vmem:[#allocation11_spill] sm:$0xff] %v3044_v38  ;;  %4458 = vst [vmem:[#allocation13_spill] sm:$0xff] %v3055_v41  ;;  %v302_v42 = vld [vmem:[%s2890_s30 + $0x82] sm:$0xff]  ;;  %v301_v43 = vld [vmem:[%s2890_s30 + $0x7a] sm:$0xff] }
  0x2c   : > { %571 = vrot.lane.b32.xlu1 %v2927_v8, %s2800_s4  ;;  %569 = vrot.lane.b32.xlu0 %v2930_v9, %s2800_s4  ;;  %v304_v44 = vld [vmem:[%s2890_s30 + $0x9a] sm:$0xff]  ;;  %v303_v45 = vld [vmem:[%s2890_s30 + $0x92] sm:$0xff] }
  0x2d   : > { %v306_v46 = vld [vmem:[%s2890_s30 + $0xb2] sm:$0xff]  ;;  %v305_v47 = vld [vmem:[%s2890_s30 + $0xaa] sm:$0xff]  ;;  %v307_v49 = vld [vmem:[%s2890_s30 + $0xc2] sm:$0xff] }
  0x2e   : > { %v308_v48 = vld [vmem:[%s2890_s30 + $0xca] sm:$0xff]  ;;  %v3077_v50 = vld [vmem:[%s2890_s30 + $0xe2] sm:$0xff]  ;;  %v3080_v51 = vld [vmem:[%s2890_s30 + $0xda] sm:$0xff] }
  0x2f   : > { %4459 = vst [vmem:[#allocation14_spill] sm:$0xff] %v3077_v50  ;;  %v3087_v52 = vld [vmem:[%s2890_s30 + $0xfa] sm:$0xff]  ;;  %v3090_v53 = vld [vmem:[%s2890_s30 + $0xf2] sm:$0xff]  ;;  %v3100_v55 = vld [vmem:[%s2890_s30 + $0x10a] sm:$0xff] }
  0x30   : > { %575 = vrot.lane.b32.xlu1 %v2937_v10, %s2800_s4  ;;  %573 = vrot.lane.b32.xlu0 %v2940_v11, %s2800_s4  ;;  %4460 = vst [vmem:[#allocation15_spill] sm:$0xff] %v3087_v52  ;;  %4461 = vst [vmem:[#allocation16_spill] sm:$0xff] %v3090_v53  ;;  %v3097_v54 = vld [vmem:[%s2890_s30 + $0x112] sm:$0xff]  ;;  %v3107_v56 = vld [vmem:[%s2890_s30 + $0x12a] sm:$0xff] }
  0x31   : > { %4462 = vst [vmem:[#allocation17_spill] sm:$0xff] %v3097_v54  ;;  %4463 = vst [vmem:[#allocation18_spill] sm:$0xff] %v3100_v55  ;;  %v3110_v57 = vld [vmem:[%s2890_s30 + $0x122] sm:$0xff]  ;;  %v317_v59 = vld [vmem:[%s2890_s30 + $0x13a] sm:$0xff] }
  0x32   : > { %4464 = vst [vmem:[#allocation19_spill] sm:$0xff] %v3107_v56  ;;  %4465 = vst [vmem:[#allocation20_spill] sm:$0xff] %v3110_v57  ;;  %v318_v58 = vld [vmem:[%s2890_s30 + $0x142] sm:$0xff]  ;;  %v320_v62 = vld [vmem:[%s2890_s30 + $0x15a] sm:$0xff] }
  0x33   : > { %v319_v63 = vld [vmem:[%s2890_s30 + $0x152] sm:$0xff] }
  0x34   : > { %579 = vrot.lane.b32.xlu1 %v2947_v12, %s2800_s4  ;;  %577 = vrot.lane.b32.xlu0 %v2950_v13, %s2800_s4 }
  0x38   : > { %583 = vrot.lane.b32.xlu1 %v2957_v14, %s2800_s4  ;;  %581 = vrot.lane.b32.xlu0 %v2960_v15, %s2800_s4 }
  0x3c   : > { %587 = vrot.lane.b32.xlu1 %v276_v16, %s2800_s4  ;;  %585 = vrot.lane.b32.xlu0 %v2968_v17, %s2800_s4  ;;  %v322_v16 = vld [vmem:[%s2890_s30 + $0x172] sm:$0xff] }
  0x40   : > { %591 = vrot.lane.b32.xlu1 %v2974_v18, %s2800_s4  ;;  %589 = vrot.lane.b32.xlu0 %v2977_v19, %s2800_s4 }
  0x44   : > { %595 = vrot.lane.b32.xlu1 %v2984_v20, %s2800_s4  ;;  %593 = vrot.lane.b32.xlu0 %v2987_v21, %s2800_s4  ;;  %v3306_v20 = vld [vmem:[%s2890_s30 + $0x138] sm:$0xff] }
  0x48   : > { %599 = vrot.lane.b32.xlu1 %v2994_v22, %s2800_s4  ;;  %597 = vrot.lane.b32.xlu0 %v2997_v23, %s2800_s4  ;;  %v3294_v22 = vld [vmem:[%s2890_s30 + $0x120] sm:$0xff]  ;;  %v258_v23 = vld [vmem:[%s2890_s30 + $0x170] sm:$0xff] }
  0x4c   : > { %603 = vrot.lane.b32.xlu1 %v284_v24, %s2800_s4  ;;  %601 = vrot.lane.b32.xlu0 %v283_v25, %s2800_s4  ;;  %v321_v24 = vld [vmem:[%s2890_s30 + $0x16a] sm:$0xff] }
  0x50   : > { %607 = vrot.lane.b32.xlu1 %v286_v26, %s2800_s4  ;;  %605 = vrot.lane.b32.xlu0 %v285_v27, %s2800_s4 }
  0x54   : > { %611 = vrot.lane.b32.xlu1 %v288_v28, %s2800_s4  ;;  %609 = vrot.lane.b32.xlu0 %v287_v29, %s2800_s4  ;;  %v3145_v29 = vld [vmem:[%s2890_s30 + $0x18] sm:$0xff] }
  0x55   : > { %4470 = vst [vmem:[#allocation25_spill] sm:$0xff] %v3145_v29 }
  0x58   : > { %615 = vrot.lane.b32.xlu1 %v290_v30, %s2800_s4  ;;  %613 = vrot.lane.b32.xlu0 %v289_v31, %s2800_s4  ;;  %v3148_v30 = vld [vmem:[%s2890_s30 + $0x20] sm:$0xff] }
  0x59   : > { %4471 = vst [vmem:[#allocation26_spill] sm:$0xff] %v3148_v30 }
  0x5c   : > { %683 = vrot.lane.b32.xlu1 %v292_v32, %s2801_s5  ;;  %681 = vrot.lane.b32.xlu0 %v291_v33, %s2801_s5  ;;  %v3159_v33 = vld [vmem:[%s2890_s30 + $0x38] sm:$0xff] }
  0x60   : > { %687 = vrot.lane.b32.xlu1 %v3024_v34, %s2801_s5  ;;  %685 = vrot.lane.b32.xlu0 %v3027_v35, %s2801_s5 }
  0x64   : > { %691 = vrot.lane.b32.xlu1 %v3034_v36, %s2801_s5  ;;  %689 = vrot.lane.b32.xlu0 %v3037_v37, %s2801_s5 }
  0x68   : > { %695 = vrot.lane.b32.xlu1 %v3044_v38, %s2801_s5  ;;  %693 = vrot.lane.b32.xlu0 %v3047_v39, %s2801_s5 }
  0x6c   : > { %699 = vrot.lane.b32.xlu1 %v300_v40, %s2801_s5  ;;  %697 = vrot.lane.b32.xlu0 %v3055_v41, %s2801_s5  ;;  %v3162_v40 = vld [vmem:[%s2890_s30 + $0x30] sm:$0xff]  ;;  %v3238_v41 = vld [vmem:[%s2890_s30 + $0xc0] sm:$0xff] }
  0x6d   : > { %4477 = vst [vmem:[#allocation32_spill] sm:$0xff] %v3238_v41 }
  0x70   : > { %703 = vrot.lane.b32.xlu1 %v302_v42, %s2801_s5  ;;  %701 = vrot.lane.b32.xlu0 %v301_v43, %s2801_s5 }
  0x74   : > { %707 = vrot.lane.b32.xlu1 %v304_v44, %s2801_s5  ;;  %705 = vrot.lane.b32.xlu0 %v303_v45, %s2801_s5  ;;  %v3173_v44 = vld [vmem:[%s2890_s30 + $0x50] sm:$0xff]  ;;  %v3176_v45 = vld [vmem:[%s2890_s30 + $0x48] sm:$0xff] }
  0x78   : > { %711 = vrot.lane.b32.xlu1 %v306_v46, %s2801_s5  ;;  %709 = vrot.lane.b32.xlu0 %v305_v47, %s2801_s5  ;;  %v240_v46 = vld [vmem:[%s2890_s30 + $0x98] sm:$0xff]  ;;  %v239_v47 = vld [vmem:[%s2890_s30 + $0x90] sm:$0xff] }
  0x7c   : > { %715 = vrot.lane.b32.xlu1 %v308_v48, %s2801_s5  ;;  %713 = vrot.lane.b32.xlu0 %v307_v49, %s2801_s5 }
  0x80   : > { %719 = vrot.lane.b32.xlu1 %v3077_v50, %s2801_s5  ;;  %717 = vrot.lane.b32.xlu0 %v3080_v51, %s2801_s5 }
  0x84   : > { %723 = vrot.lane.b32.xlu1 %v3087_v52, %s2801_s5  ;;  %721 = vrot.lane.b32.xlu0 %v3090_v53, %s2801_s5  ;;  %v257_v52 = vld [vmem:[%s2890_s30 + $0x168] sm:$0xff]  ;;  %v3303_v53 = vld [vmem:[%s2890_s30 + $0x140] sm:$0xff] }
  0x88   : > { %727 = vrot.lane.b32.xlu1 %v3097_v54, %s2801_s5  ;;  %725 = vrot.lane.b32.xlu0 %v3100_v55, %s2801_s5  ;;  %v3280_v54 = vld [vmem:[%s2890_s30 + $0x108] sm:$0xff] }
  0x89   : > { %v3291_v55 = vld [vmem:[%s2890_s30 + $0x128] sm:$0xff] }
  0x8c   : > { %731 = vrot.lane.b32.xlu1 %v3107_v56, %s2801_s5  ;;  %729 = vrot.lane.b32.xlu0 %v3110_v57, %s2801_s5  ;;  %v3277_v57 = vld [vmem:[%s2890_s30 + $0x110] sm:$0xff] }
  0x8e   : > { %v3118_v60 = vpop.permute.xlu1 %557  ;;  %v3120_v61 = vpop.permute.xlu0 %553 }
  0x8f   : > { %4466 = vst [vmem:[#allocation21_spill] sm:$0xff] %v3118_v60  ;;  %4467 = vst [vmem:[#allocation22_spill] sm:$0xff] %v3120_v61  ;;  %v3206_v60 = vld [vmem:[%s2890_s30 + $0x78] sm:$0xff] }
  0x90   : > { %735 = vrot.lane.b32.xlu1 %v318_v58, %s2801_s5  ;;  %733 = vrot.lane.b32.xlu0 %v317_v59, %s2801_s5  ;;  %v3185_v58 = vld [vmem:[%s2890_s30 + $0x68] sm:$0xff]  ;;  %v3188_v59 = vld [vmem:[%s2890_s30 + $0x60] sm:$0xff] }
  0x92   : > { %v3126_v1 = vpop.permute.xlu1 %559  ;;  %v3128_v3 = vpop.permute.xlu0 %555 }
  0x93   : > { %4468 = vst [vmem:[#allocation23_spill] sm:$0xff] %v3126_v1  ;;  %4469 = vst [vmem:[#allocation24_spill] sm:$0xff] %v3128_v3 }
  0x94   : > { %739 = vrot.lane.b32.xlu1 %v320_v62, %s2801_s5  ;;  %737 = vrot.lane.b32.xlu0 %v319_v63, %s2801_s5 }
  0x96   : > { %v3134_v25 = vpop.permute.xlu1 %563  ;;  %v3136_v26 = vpop.permute.xlu0 %561 }
  0x98   : > { %743 = vrot.lane.b32.xlu1 %v322_v16, %s2801_s5  ;;  %741 = vrot.lane.b32.xlu0 %v321_v24, %s2801_s5  ;;  %v242_v16 = vld [vmem:[%s2890_s30 + $0xb0] sm:$0xff]  ;;  %v241_v24 = vld [vmem:[%s2890_s30 + $0xa8] sm:$0xff] }
  0x9a   : > { %v3140_v27 = vpop.permute.xlu1 %567  ;;  %v3142_v28 = vpop.permute.xlu0 %565 }
  0x9c   : > { %811 = vrot.lane.b32.xlu1 %v3148_v30, %s2802_s6  ;;  %809 = vrot.lane.b32.xlu0 %v3145_v29, %s2802_s6  ;;  %v3203_v29 = vld [vmem:[%s2890_s30 + $0x80] sm:$0xff] }
  0x9e   : > { %v3154_v31 = vpop.permute.xlu1 %571  ;;  %v3156_v32 = vpop.permute.xlu0 %569 }
  0xa0   : > { %815 = vrot.lane.b32.xlu1 %v3159_v33, %s2802_s6  ;;  %813 = vrot.lane.b32.xlu0 %v3162_v40, %s2802_s6 }
  0xa2   : > { %v3168_v42 = vpop.permute.xlu1 %575  ;;  %v3170_v43 = vpop.permute.xlu0 %573 }
  0xa4   : > { %819 = vrot.lane.b32.xlu1 %v3173_v44, %s2802_s6  ;;  %817 = vrot.lane.b32.xlu0 %v3176_v45, %s2802_s6 }
  0xa6   : > { %v580_v48 = vpop.permute.xlu1 %579  ;;  %v578_v49 = vpop.permute.xlu0 %577 }
  0xa7   : > { %v3191_v62 = vsel %vm1545_vm0, %v240_v46, %v580_v48  ;;  %v3194_v63 = vsel %vm1545_vm0, %v239_v47, %v578_v49 }
  0xa8   : > { %823 = vrot.lane.b32.xlu1 %v3185_v58, %s2802_s6  ;;  %821 = vrot.lane.b32.xlu0 %v3188_v59, %s2802_s6 }
  0xaa   : > { %v584_v30 = vpop.permute.xlu1 %583  ;;  %v582_v1 = vpop.permute.xlu0 %581 }
  0xab   : > { %v3209_v48 = vsel %vm1545_vm0, %v242_v16, %v584_v30  ;;  %v3212_v49 = vsel %vm1545_vm0, %v241_v24, %v582_v1 }
  0xac   : > { %827 = vrot.lane.b32.xlu1 %v3203_v29, %s2802_s6  ;;  %825 = vrot.lane.b32.xlu0 %v3206_v60, %s2802_s6 }
  0xae   : > { %v3218_v3 = vpop.permute.xlu1 %587  ;;  %v3220_v61 = vpop.permute.xlu0 %585 }
  0xaf   : > { %4472 = vst [vmem:[#allocation27_spill] sm:$0xff] %v3218_v3  ;;  %4473 = vst [vmem:[#allocation28_spill] sm:$0xff] %v3220_v61  ;;  %v3235_v61 = vld [vmem:[%s2890_s30 + $0xc8] sm:$0xff] }
  0xb0   : > { %831 = vrot.lane.b32.xlu1 %v240_v46, %s2802_s6  ;;  %829 = vrot.lane.b32.xlu0 %v239_v47, %s2802_s6  ;;  %4476 = vst [vmem:[#allocation31_spill] sm:$0xff] %v3235_v61 }
  0xb2   : > { %v3224_v30 = vpop.permute.xlu1 %591  ;;  %v3226_v1 = vpop.permute.xlu0 %589 }
  0xb3   : > { %4474 = vst [vmem:[#allocation29_spill] sm:$0xff] %v3224_v30  ;;  %4475 = vst [vmem:[#allocation30_spill] sm:$0xff] %v3226_v1 }
  0xb4   : > { %835 = vrot.lane.b32.xlu1 %v242_v16, %s2802_s6  ;;  %833 = vrot.lane.b32.xlu0 %v241_v24, %s2802_s6  ;;  %v3249_v16 = vld [vmem:[%s2890_s30 + $0xe0] sm:$0xff]  ;;  %v3252_v24 = vld [vmem:[%s2890_s30 + $0xd8] sm:$0xff] }
  0xb5   : > { %4478 = vst [vmem:[#allocation33_spill] sm:$0xff] %v3249_v16  ;;  %4479 = vst [vmem:[#allocation34_spill] sm:$0xff] %v3252_v24 }
  0xb6   : > { %v3230_v56 = vpop.permute.xlu1 %595  ;;  %v3232_v3 = vpop.permute.xlu0 %593 }
  0xb8   : > { %839 = vrot.lane.b32.xlu1 %v3235_v61, %s2802_s6  ;;  %837 = vrot.lane.b32.xlu0 %v3238_v41, %s2802_s6  ;;  %v3263_v61 = vld [vmem:[%s2890_s30 + $0xf8] sm:$0xff]  ;;  %v3266_v41 = vld [vmem:[%s2890_s30 + $0xf0] sm:$0xff] }
  0xba   : > { %v3244_v46 = vpop.permute.xlu1 %599  ;;  %v3246_v47 = vpop.permute.xlu0 %597 }
  0xbc   : > { %843 = vrot.lane.b32.xlu1 %v3249_v16, %s2802_s6  ;;  %841 = vrot.lane.b32.xlu0 %v3252_v24, %s2802_s6 }
  0xbe   : > { %v3258_v30 = vpop.permute.xlu1 %603  ;;  %v3260_v1 = vpop.permute.xlu0 %601 }
  0xc0   : > { %847 = vrot.lane.b32.xlu1 %v3263_v61, %s2802_s6  ;;  %845 = vrot.lane.b32.xlu0 %v3266_v41, %s2802_s6 }
  0xc2   : > { %v3272_v16 = vpop.permute.xlu1 %607  ;;  %v3274_v24 = vpop.permute.xlu0 %605 }
  0xc3   : > { %4480 = vst [vmem:[#allocation35_spill] sm:$0xff] %v3272_v16  ;;  %4481 = vst [vmem:[#allocation36_spill] sm:$0xff] %v3274_v24  ;;  %v3323_v24 = vld [vmem:[%s2890_s30 + $0x158] sm:$0xff]  ;;  %v3326_v16 = vld [vmem:[%s2890_s30 + $0x150] sm:$0xff] }
  0xc4   : > { %851 = vrot.lane.b32.xlu1 %v3277_v57, %s2802_s6  ;;  %849 = vrot.lane.b32.xlu0 %v3280_v54, %s2802_s6  ;;  %4488 = vst [vmem:[#allocation43_spill] sm:$0xff] %v3323_v24  ;;  %4489 = vst [vmem:[#allocation44_spill] sm:$0xff] %v3326_v16 }
  0xc6   : > { %v3286_v38 = vpop.permute.xlu1 %611  ;;  %v3288_v39 = vpop.permute.xlu0 %609 }
  0xc7   : > { %4482 = vst [vmem:[#allocation37_spill] sm:$0xff] %v3286_v38  ;;  %4483 = vst [vmem:[#allocation38_spill] sm:$0xff] %v3288_v39 }
  0xc8   : > { %855 = vrot.lane.b32.xlu1 %v3291_v55, %s2802_s6  ;;  %853 = vrot.lane.b32.xlu0 %v3294_v22, %s2802_s6 }
  0xca   : > { %v616_v36 = vpop.permute.xlu1 %615  ;;  %v614_v37 = vpop.permute.xlu0 %613 }
  0xcb   : > { %v3309_v21 = vsel %vm1545_vm0, %v258_v23, %v616_v36  ;;  %v3312_v39 = vsel %vm1545_vm0, %v257_v52, %v614_v37 }
  0xcc   : > { %4484 = vst [vmem:[#allocation39_spill] sm:$0xff] %v3309_v21  ;;  %4485 = vst [vmem:[#allocation40_spill] sm:$0xff] %v3312_v39  ;;  %859 = vrot.lane.b32.xlu1 %v3303_v53, %s2802_s6  ;;  %857 = vrot.lane.b32.xlu0 %v3306_v20, %s2802_s6  ;;  %v1551_v39 = vsel %vm1545_vm0, %v3159_v33, %v3134_v25  ;;  %v1550_v21 = vsel %vm1545_vm0, %v3162_v40, %v3136_v26 }
  0xcd   : > { %v1552_v25 = vsel %vm1545_vm0, %v3176_v45, %v3142_v28 }
  0xce   : > { %v3318_v38 = vpop.permute.xlu1 %683  ;;  %v3320_v50 = vpop.permute.xlu0 %681 }
  0xcf   : > { %4486 = vst [vmem:[#allocation41_spill] sm:$0xff] %v3318_v38  ;;  %4487 = vst [vmem:[#allocation42_spill] sm:$0xff] %v3320_v50  ;;  %v2351_v38 = vld [vmem:[%s2890_s30 + $0x188] sm:$0xff]  ;;  %v2350_v50 = vld [vmem:[%s2890_s30 + $0x180] sm:$0xff] }
  0xd0   : > { %863 = vrot.lane.b32.xlu1 %v3323_v24, %s2802_s6  ;;  %861 = vrot.lane.b32.xlu0 %v3326_v16, %s2802_s6 }
  0xd2   : > { %v3332_v36 = vpop.permute.xlu1 %687  ;;  %v3334_v37 = vpop.permute.xlu0 %685 }
  0xd3   : > { %4490 = vst [vmem:[#allocation45_spill] sm:$0xff] %v3332_v36  ;;  %4491 = vst [vmem:[#allocation46_spill] sm:$0xff] %v3334_v37 }
  0xd4   : > { %867 = vrot.lane.b32.xlu1 %v258_v23, %s2802_s6  ;;  %865 = vrot.lane.b32.xlu0 %v257_v52, %s2802_s6  ;;  %v1553_v52 = vsel %vm1545_vm0, %v3173_v44, %v3140_v27 }
  0xd6   : > { %v692_v16 = vpop.permute.xlu1 %691  ;;  %v690_v24 = vpop.permute.xlu0 %689 }
  0xd7   : > { %v3347_v36 = vsel %vm1578_vm1, %v1551_v39, %v692_v16  ;;  %v3350_v23 = vsel %vm1578_vm1, %v1550_v21, %v690_v24 }
  0xd8   : > { %871 = vrot.lane.b32.xlu1 %v2351_v38, %s2802_s6  ;;  %869 = vrot.lane.b32.xlu0 %v2350_v50, %s2802_s6  ;;  %v1555_v38 = vsel %vm1545_vm0, %v3185_v58, %v3154_v31  ;;  %v1554_v50 = vsel %vm1545_vm0, %v3188_v59, %v3156_v32  ;;  %s2807_s6 = smov 32  }
  0xda   : > { %v696_v26 = vpop.permute.xlu1 %695  ;;  %v694_v37 = vpop.permute.xlu0 %693 }
  0xdb   : > { %v3361_v39 = vsel %vm1578_vm1, %v1553_v52, %v696_v26  ;;  %v3364_v21 = vsel %vm1578_vm1, %v1552_v25, %v694_v37 }
  0xdc   : > { %939 = vrot.lane.b32.xlu1 %v2900_v2, %s2803_s7  ;;  %937 = vrot.lane.b32.xlu0 %v2893_v0, %s2803_s7  ;;  %v1557_v0 = vsel %vm1545_vm0, %v3203_v29, %v3168_v42  ;;  %v1556_v2 = vsel %vm1545_vm0, %v3206_v60, %v3170_v43 }
  0xde   : > { %v700_v27 = vpop.permute.xlu1 %699  ;;  %v698_v28 = vpop.permute.xlu0 %697 }
  0xdf   : > { %v3377_v16 = vsel %vm1578_vm1, %v1555_v38, %v700_v27  ;;  %v3380_v24 = vsel %vm1578_vm1, %v1554_v50, %v698_v28 }
  0xe0   : > { %943 = vrot.lane.b32.xlu1 %v2907_v4, %s2803_s7  ;;  %941 = vrot.lane.b32.xlu0 %v2910_v5, %s2803_s7 }
  0xe2   : > { %v704_v31 = vpop.permute.xlu1 %703  ;;  %v702_v32 = vpop.permute.xlu0 %701 }
  0xe3   : > { %v3393_v37 = vsel %vm1578_vm1, %v1557_v0, %v704_v31  ;;  %v3396_v52 = vsel %vm1578_vm1, %v1556_v2, %v702_v32 }
  0xe4   : > { %947 = vrot.lane.b32.xlu1 %v2917_v6, %s2803_s7  ;;  %945 = vrot.lane.b32.xlu0 %v2920_v7, %s2803_s7 }
  0xe6   : > { %v708_v25 = vpop.permute.xlu1 %707  ;;  %v706_v42 = vpop.permute.xlu0 %705 }
  0xe7   : > { %v3404_v26 = vsel %vm1578_vm1, %v3191_v62, %v708_v25  ;;  %v3408_v43 = vsel %vm1578_vm1, %v3194_v63, %v706_v42 }
  0xe8   : > { %951 = vrot.lane.b32.xlu1 %v2927_v8, %s2803_s7  ;;  %949 = vrot.lane.b32.xlu0 %v2930_v9, %s2803_s7 }
  0xea   : > { %v712_v38 = vpop.permute.xlu1 %711  ;;  %v710_v50 = vpop.permute.xlu0 %709 }
  0xeb   : > { %v3416_v27 = vsel %vm1578_vm1, %v3209_v48, %v712_v38  ;;  %v3420_v62 = vsel %vm1578_vm1, %v3212_v49, %v710_v50 }
  0xec   : > { %955 = vrot.lane.b32.xlu1 %v2937_v10, %s2803_s7  ;;  %953 = vrot.lane.b32.xlu0 %v2940_v11, %s2803_s7  ;;  %v1567_v10 = vsel %vm1545_vm0, %v3263_v61, %v3230_v56  ;;  %v1566_v11 = vsel %vm1545_vm0, %v3266_v41, %v3232_v3 }
  0xee   : > { %v3426_v8 = vpop.permute.xlu1 %715  ;;  %v3428_v63 = vpop.permute.xlu0 %713 }
  0xf0   : > { %959 = vrot.lane.b32.xlu1 %v2947_v12, %s2803_s7  ;;  %957 = vrot.lane.b32.xlu0 %v2950_v13, %s2803_s7 }
  0xf2   : > { %v3434_v9 = vpop.permute.xlu1 %719  ;;  %v3436_v48 = vpop.permute.xlu0 %717 }
  0xf4   : > { %963 = vrot.lane.b32.xlu1 %v2957_v14, %s2803_s7  ;;  %961 = vrot.lane.b32.xlu0 %v2960_v15, %s2803_s7  ;;  %v1569_v14 = vsel %vm1545_vm0, %v3277_v57, %v3244_v46  ;;  %v1568_v15 = vsel %vm1545_vm0, %v3280_v54, %v3246_v47 }
  0xf6   : > { %v724_v12 = vpop.permute.xlu1 %723  ;;  %v722_v13 = vpop.permute.xlu0 %721 }
  0xf7   : > { %v3449_v49 = vsel %vm1578_vm1, %v1567_v10, %v724_v12  ;;  %v3452_v28 = vsel %vm1578_vm1, %v1566_v11, %v722_v13  ;;  %v4496_v10 = vld [vmem:[#allocation43_spill] sm:$0xff]  ;;  %v4497_v12 = vld [vmem:[#allocation38_spill] sm:$0xff]  ;;  %v4498_v13 = vld [vmem:[#allocation44_spill] sm:$0xff] }
  0xf8   : > { %969 = vrot.lane.b32.xlu1 %v2977_v19, %s2803_s7  ;;  %965 = vrot.lane.b32.xlu0 %v2968_v17, %s2803_s7  ;;  %v1571_v17 = vsel %vm1545_vm0, %v3291_v55, %v3258_v30  ;;  %v1570_v19 = vsel %vm1545_vm0, %v3294_v22, %v3260_v1  ;;  %v4493_v30 = vld [vmem:[#allocation36_spill] sm:$0xff] }
  0xf9   : > { %v1572_v1 = vsel %vm1545_vm0, %v3306_v20, %v4493_v30  ;;  %v1811_v30 = vld [vmem:[%s4404_s1 + $0x10] sm:$0xff] }
  0xfa   : > { %v728_v56 = vpop.permute.xlu1 %727  ;;  %v726_v3 = vpop.permute.xlu0 %725 }
  0xfb   : > { %v3465_v0 = vsel %vm1578_vm1, %v1569_v14, %v728_v56  ;;  %v3468_v2 = vsel %vm1578_vm1, %v1568_v15, %v726_v3  ;;  %v1574_v14 = vsel %vm1545_vm0, %v4498_v13, %v4497_v12 }
  0xfc   : > { %1065 = vrot.lane.b32.xlu1 %v3027_v35, %s2804_s8  ;;  %971 = vrot.lane.b32.xlu0 %v2974_v18, %s2803_s7  ;;  %v4492_v18 = vld [vmem:[#allocation35_spill] sm:$0xff] }
  0xfd   : > { %v1573_v35 = vsel %vm1545_vm0, %v3303_v53, %v4492_v18  ;;  %v4499_v18 = vld [vmem:[#allocation39_spill] sm:$0xff] }
  0xfe   : > { %v732_v46 = vpop.permute.xlu1 %731  ;;  %v730_v47 = vpop.permute.xlu0 %729 }
  0xff   : > { %v3481_v31 = vsel %vm1578_vm1, %v1571_v17, %v732_v46  ;;  %v3484_v32 = vsel %vm1578_vm1, %v1570_v19, %v730_v47  ;;  %v1812_v47 = vld [vmem:[%s4404_s1 + $0x18] sm:$0xff] }
 0x100   : > { %1067 = vrot.lane.b32.xlu1 %v3024_v34, %s2804_s8  ;;  %1097 = vrot.lane.b32.xlu0 %v3080_v51, %s2804_s8  ;;  %v4494_v34 = vld [vmem:[#allocation14_spill] sm:$0xff]  ;;  %v4495_v51 = vld [vmem:[#allocation37_spill] sm:$0xff] }
 0x101   : > { %v1575_v11 = vsel %vm1545_vm0, %v4496_v10, %v4495_v51 }
 0x102   : > { %v736_v25 = vpop.permute.xlu1 %735  ;;  %v734_v42 = vpop.permute.xlu0 %733 }
 0x103   : > { %v3497_v38 = vsel %vm1578_vm1, %v1573_v35, %v736_v25  ;;  %v3500_v50 = vsel %vm1578_vm1, %v1572_v1, %v734_v42  ;;  %v1809_v42 = vld [vmem:[%s4404_s1] sm:$0xff] }
 0x104   : > { %1193 = vrot.lane.b32.xlu1 %v3162_v40, %s2805_s9  ;;  %1099 = vrot.lane.b32.xlu0 %v4494_v34, %s2804_s8  ;;  %v1813_v40 = vld [vmem:[%s4404_s1 + $0x20] sm:$0xf] }
 0x105   : > { %2589 = vmatprep.subr.msk.mxu0 %vm1918_vm2, %v1813_v40  ;;  %2647 = vmatprep.subr.msk.mxu1 %vm1918_vm2, %v1813_v40 }
 0x106   : > { %v740_v15 = vpop.permute.xlu1 %739  ;;  %v738_v56 = vpop.permute.xlu0 %737  ;;  %2590 = vmatpush3.msk.msra.mxu0 %vm1918_vm2, %v1813_v40  ;;  %2652 = vmatpush3.msk.msra.mxu1 %vm1918_vm2, %v1813_v40  ;;  %v4503_v40 = vld [vmem:[#allocation16_spill] sm:$0xff] }
 0x107   : > { %v3513_v3 = vsel %vm1578_vm1, %v1575_v11, %v740_v15  ;;  %v3516_v17 = vsel %vm1578_vm1, %v1574_v14, %v738_v56  ;;  %2591 = vmatprep.subr.mxu0 %v1812_v47  ;;  %2648 = vmatprep.subr.mxu1 %v1812_v47  ;;  %v4502_v11 = vld [vmem:[#allocation5_spill] sm:$0xff] }
 0x108   : > { %1195 = vrot.lane.b32.xlu1 %v3159_v33, %s2805_s9  ;;  %1225 = vrot.lane.b32.xlu0 %v3266_v41, %s2805_s9  ;;  %v4500_v41 = vld [vmem:[#allocation40_spill] sm:$0xff] }
 0x109   : > { %2592 = vmatpush3.msra.mxu0 %v1812_v47  ;;  %2653 = vmatpush3.msra.mxu1 %v1812_v47 }
 0x10a   : > { %v744_v19 = vpop.permute.xlu1 %743  ;;  %v742_v46 = vpop.permute.xlu0 %741  ;;  %2593 = vmatprep.subr.mxu0 %v1811_v30  ;;  %2649 = vmatprep.subr.mxu1 %v1811_v30 }
 0x10b   : > { %v3530_v33 = vsel %vm1578_vm1, %v4499_v18, %v744_v19  ;;  %v3534_v35 = vsel %vm1578_vm1, %v4500_v41, %v742_v46  ;;  %2594 = vmatpush3.msra.mxu0 %v1811_v30  ;;  %2654 = vmatpush3.msra.mxu1 %v1811_v30  ;;  %v4504_v19 = vld [vmem:[#allocation10_spill] sm:$0xff]  ;;  %v4505_v30 = vld [vmem:[#allocation9_spill] sm:$0xff] }
 0x10c   : > { %1321 = vrot.lane.b32.xlu1 %v2910_v5, %s2806_s21  ;;  %1227 = vrot.lane.b32.xlu0 %v3263_v61, %s2805_s9  ;;  %v1810_v5 = vld [vmem:[%s4404_s1 + $0x8] sm:$0xff] }
 0x10d   : > { %v4501_v61 = vld [vmem:[#allocation6_spill] sm:$0xff]  ;;  %2595 = vmatprep.subr.mxu0 %v1810_v5  ;;  %2650 = vmatprep.subr.mxu1 %v1810_v5 }
 0x10e   : > { %v3543_v1 = vpop.permute.xlu1 %811  ;;  %v3545_v25 = vpop.permute.xlu0 %809  ;;  %2596 = vmatpush3.msra.mxu0 %v1810_v5  ;;  %2655 = vmatpush3.msra.mxu1 %v1810_v5 }
 0x10f   : > { %2597 = vmatprep.subr.mxu0 %v1809_v42  ;;  %2651 = vmatprep.subr.mxu1 %v1809_v42 }
 0x110   : > { %973 = vrot.lane.b32.xlu1 %v4501_v61, %s2803_s7  ;;  %1353 = vrot.lane.b32.xlu0 %v4501_v61, %s2806_s21 }
 0x111   : > { %2598 = vmatpush3.msra.mxu0 %v1809_v42  ;;  %2656 = vmatpush3.msra.mxu1 %v1809_v42 }
 0x112   : > { %v3557_v34 = vpop.permute.xlu1 %815  ;;  %v3559_v51 = vpop.permute.xlu0 %813 }
 0x114   : > { %1355 = vrot.lane.b32.xlu1 %v4502_v11, %s2806_s21  ;;  %1323 = vrot.lane.b32.xlu0 %v2907_v4, %s2806_s21 }
 0x116   : > { %v820_v12 = vpop.permute.xlu1 %819  ;;  %v818_v14 = vpop.permute.xlu0 %817 }
 0x117   : > { %v3567_v15 = vsel %vm1611_vm3, %v3347_v36, %v820_v12  ;;  %v3571_v56 = vsel %vm1611_vm3, %v3350_v23, %v818_v14 }
 0x118   : > { %1481 = vrot.lane.b32.xlu1 %v4503_v40, %s2807_s6  ;;  %1449 = vrot.lane.b32.xlu0 %v4504_v19, %s2807_s6 }
 0x11a   : > { %v824_v4 = vpop.permute.xlu1 %823  ;;  %v822_v46 = vpop.permute.xlu0 %821 }
 0x11b   : > { %v3579_v47 = vsel %vm1611_vm3, %v3361_v39, %v824_v4  ;;  %v3583_v36 = vsel %vm1611_vm3, %v3364_v21, %v822_v46 }
 0x11c   : > { %1069 = vrot.lane.b32.xlu1 %v4504_v19, %s2804_s8  ;;  %975 = vrot.lane.b32.xlu0 %v4502_v11, %s2803_s7  ;;  %v4512_v19 = vld [vmem:[#allocation8_spill] sm:$0xff] }
 0x11e   : > { %v828_v23 = vpop.permute.xlu1 %827  ;;  %v826_v18 = vpop.permute.xlu0 %825 }
 0x11f   : > { %v3591_v41 = vsel %vm1611_vm3, %v3377_v16, %v828_v23  ;;  %v3595_v39 = vsel %vm1611_vm3, %v3380_v24, %v826_v18  ;;  %v4507_v24 = vld [vmem:[#allocation15_spill] sm:$0xff] }
 0x120   : > { %1451 = vrot.lane.b32.xlu1 %v4505_v30, %s2807_s6  ;;  %1101 = vrot.lane.b32.xlu0 %v4503_v40, %s2804_s8 }
 0x122   : > { %v832_v21 = vpop.permute.xlu1 %831  ;;  %v830_v5 = vpop.permute.xlu0 %829 }
 0x123   : > { %v3603_v61 = vsel %vm1611_vm3, %v3393_v37, %v832_v21  ;;  %v3607_v16 = vsel %vm1611_vm3, %v3396_v52, %v830_v5 }
 0x124   : > { %4506 = vst [vmem:[#allocation35_spill] sm:$0xff] %v3603_v61  ;;  %1071 = vrot.lane.b32.xlu1 %v4505_v30, %s2804_s8  ;;  %1483 = vrot.lane.b32.xlu0 %v4507_v24, %s2807_s6  ;;  %v4514_v30 = vld [vmem:[#allocation18_spill] sm:$0xff] }
 0x125   : > { %v4534_v61 = vld [vmem:[#allocation42_spill] sm:$0xff] }
 0x126   : > { %v836_v42 = vpop.permute.xlu1 %835  ;;  %v834_v11 = vpop.permute.xlu0 %833 }
 0x127   : > { %v3615_v12 = vsel %vm1611_vm3, %v3404_v26, %v836_v42  ;;  %v3619_v37 = vsel %vm1611_vm3, %v3408_v43, %v834_v11  ;;  %v4518_v11 = vld [vmem:[#allocation11_spill] sm:$0xff] }
 0x128   : > { %4508 = vst [vmem:[#allocation36_spill] sm:$0xff] %v3615_v12  ;;  %4509 = vst [vmem:[#allocation14_spill] sm:$0xff] %v3619_v37  ;;  %1197 = vrot.lane.b32.xlu1 %v3176_v45, %s2805_s9  ;;  %1103 = vrot.lane.b32.xlu0 %v4507_v24, %s2804_s8 }
 0x12a   : > { %v840_v52 = vpop.permute.xlu1 %839  ;;  %v838_v14 = vpop.permute.xlu0 %837 }
 0x12b   : > { %v3627_v40 = vsel %vm1611_vm3, %v3416_v27, %v840_v52  ;;  %v3631_v26 = vsel %vm1611_vm3, %v3420_v62, %v838_v14 }
 0x12c   : > { %4510 = vst [vmem:[#allocation37_spill] sm:$0xff] %v3627_v40  ;;  %4511 = vst [vmem:[#allocation43_spill] sm:$0xff] %v3631_v26  ;;  %1199 = vrot.lane.b32.xlu1 %v3173_v44, %s2805_s9  ;;  %1229 = vrot.lane.b32.xlu0 %v3280_v54, %s2805_s9 }
 0x12e   : > { %v3637_v45 = vpop.permute.xlu1 %843  ;;  %v3639_v43 = vpop.permute.xlu0 %841 }
 0x130   : > { %1325 = vrot.lane.b32.xlu1 %v2920_v7, %s2806_s21  ;;  %1231 = vrot.lane.b32.xlu0 %v3277_v57, %s2805_s9  ;;  %v4513_v57 = vld [vmem:[#allocation7_spill] sm:$0xff] }
 0x132   : > { %v3645_v27 = vpop.permute.xlu1 %847  ;;  %v3647_v62 = vpop.permute.xlu0 %845 }
 0x134   : > { %977 = vrot.lane.b32.xlu1 %v4512_v19, %s2803_s7  ;;  %1357 = vrot.lane.b32.xlu0 %v4512_v19, %s2806_s21 }
 0x136   : > { %v852_v54 = vpop.permute.xlu1 %851  ;;  %v850_v44 = vpop.permute.xlu0 %849 }
 0x137   : > { %v3655_v4 = vsel %vm1611_vm3, %v3449_v49, %v852_v54  ;;  %v3659_v7 = vsel %vm1611_vm3, %v3452_v28, %v850_v44  ;;  %v4515_v28 = vld [vmem:[#allocation12_spill] sm:$0xff] }
 0x138   : > { %1359 = vrot.lane.b32.xlu1 %v4513_v57, %s2806_s21  ;;  %1327 = vrot.lane.b32.xlu0 %v2917_v6, %s2806_s21 }
 0x13a   : > { %v856_v46 = vpop.permute.xlu1 %855  ;;  %v854_v23 = vpop.permute.xlu0 %853 }
 0x13b   : > { %v3667_v18 = vsel %vm1611_vm3, %v3465_v0, %v856_v46  ;;  %v3671_v49 = vsel %vm1611_vm3, %v3468_v2, %v854_v23 }
 0x13c   : > { %1485 = vrot.lane.b32.xlu1 %v4514_v30, %s2807_s6  ;;  %1453 = vrot.lane.b32.xlu0 %v4515_v28, %s2807_s6 }
 0x13e   : > { %v860_v21 = vpop.permute.xlu1 %859  ;;  %v858_v5 = vpop.permute.xlu0 %857 }
 0x13f   : > { %v3679_v6 = vsel %vm1611_vm3, %v3481_v31, %v860_v21  ;;  %v3683_v0 = vsel %vm1611_vm3, %v3484_v32, %v858_v5 }
 0x140   : > { %1073 = vrot.lane.b32.xlu1 %v4515_v28, %s2804_s8  ;;  %979 = vrot.lane.b32.xlu0 %v4513_v57, %s2803_s7 }
 0x142   : > { %v864_v2 = vpop.permute.xlu1 %863  ;;  %v862_v24 = vpop.permute.xlu0 %861 }
 0x143   : > { %v3691_v42 = vsel %vm1611_vm3, %v3497_v38, %v864_v2  ;;  %v3695_v31 = vsel %vm1611_vm3, %v3500_v50, %v862_v24  ;;  %v4521_v50 = vld [vmem:[#allocation17_spill] sm:$0xff]  ;;  %v4524_v2 = vld [vmem:[#allocation20_spill] sm:$0xff] }
 0x144   : > { %4516 = vst [vmem:[#allocation38_spill] sm:$0xff] %v3691_v42  ;;  %4517 = vst [vmem:[#allocation44_spill] sm:$0xff] %v3695_v31  ;;  %1455 = vrot.lane.b32.xlu1 %v4518_v11, %s2807_s6  ;;  %1105 = vrot.lane.b32.xlu0 %v4514_v30, %s2804_s8  ;;  %v4525_v24 = vld [vmem:[#allocation13_spill] sm:$0xff] }
 0x146   : > { %v868_v32 = vpop.permute.xlu1 %867  ;;  %v866_v52 = vpop.permute.xlu0 %865 }
 0x147   : > { %v3703_v14 = vsel %vm1611_vm3, %v3513_v3, %v868_v32  ;;  %v3707_v38 = vsel %vm1611_vm3, %v3516_v17, %v866_v52  ;;  %v2485_v52 = vld [vmem:[%s2890_s30 + $0x6a] sm:$0xff] }
 0x148   : > { %4519 = vst [vmem:[#allocation39_spill] sm:$0xff] %v3703_v14  ;;  %4520 = vst [vmem:[#allocation40_spill] sm:$0xff] %v3707_v38  ;;  %1075 = vrot.lane.b32.xlu1 %v4518_v11, %s2804_s8  ;;  %1487 = vrot.lane.b32.xlu0 %v4521_v50, %s2807_s6  ;;  %v2502_v14 = vld [vmem:[%s2890_s30 + $0x13a] sm:$0xff]  ;;  %v4531_v38 = vld [vmem:[#allocation22_spill] sm:$0xff] }
 0x14a   : > { %v872_v19 = vpop.permute.xlu1 %871  ;;  %v870_v54 = vpop.permute.xlu0 %869 }
 0x14b   : > { %v3715_v44 = vsel %vm1611_vm3, %v3530_v33, %v872_v19  ;;  %v3719_v3 = vsel %vm1611_vm3, %v3534_v35, %v870_v54  ;;  %v2452_v33 = vld [vmem:[%s2890_s30 + $0x61] sm:$0xff] }
 0x14c   : > { %4522 = vst [vmem:[#allocation6_spill] sm:$0xff] %v3715_v44  ;;  %4523 = vst [vmem:[#allocation5_spill] sm:$0xff] %v3719_v3  ;;  %1201 = vrot.lane.b32.xlu1 %v3188_v59, %s2805_s9  ;;  %1107 = vrot.lane.b32.xlu0 %v4521_v50, %s2804_s8  ;;  %v2374_v59 = vld [vmem:[%s2890_s30 + $0x121] sm:$0xff] }
 0x14e   : > { %v3725_v17 = vpop.permute.xlu1 %939  ;;  %v3727_v57 = vpop.permute.xlu0 %937 }
 0x150   : > { %1203 = vrot.lane.b32.xlu1 %v3185_v58, %s2805_s9  ;;  %1233 = vrot.lane.b32.xlu0 %v3294_v22, %s2805_s9  ;;  %v2469_v22 = vld [vmem:[%s2890_s30 + $0x129] sm:$0xff] }
 0x151   : > { %v2453_v58 = vld [vmem:[%s2890_s30 + $0x69] sm:$0xff] }
 0x152   : > { %v3734_v35 = vpop.permute.xlu1 %943  ;;  %v3736_v46 = vpop.permute.xlu0 %941 }
 0x154   : > { %1329 = vrot.lane.b32.xlu1 %v2452_v33, %s2806_s21  ;;  %1235 = vrot.lane.b32.xlu0 %v3291_v55, %s2805_s9 }
 0x156   : > { %v3742_v23 = vpop.permute.xlu1 %947  ;;  %v3744_v30 = vpop.permute.xlu0 %945 }
 0x158   : > { %981 = vrot.lane.b32.xlu1 %v2374_v59, %s2803_s7  ;;  %1361 = vrot.lane.b32.xlu0 %v2374_v59, %s2806_s21  ;;  %v4530_v59 = vld [vmem:[#allocation19_spill] sm:$0xff] }
 0x15a   : > { %v3750_v28 = vpop.permute.xlu1 %951  ;;  %v3752_v21 = vpop.permute.xlu0 %949 }
 0x15c   : > { %1363 = vrot.lane.b32.xlu1 %v2469_v22, %s2806_s21  ;;  %1331 = vrot.lane.b32.xlu0 %v2453_v58, %s2806_s21 }
 0x15e   : > { %v3756_v55 = vpop.permute.xlu1 %955  ;;  %v3758_v5 = vpop.permute.xlu0 %953 }
 0x160   : > { %1489 = vrot.lane.b32.xlu1 %v4524_v2, %s2807_s6  ;;  %1457 = vrot.lane.b32.xlu0 %v4525_v24, %s2807_s6 }
 0x162   : > { %v3764_v11 = vpop.permute.xlu1 %959  ;;  %v3766_v32 = vpop.permute.xlu0 %957 }
 0x163   : > { %4526 = vst [vmem:[#allocation16_spill] sm:$0xff] %v3764_v11 }
 0x164   : > { %1077 = vrot.lane.b32.xlu1 %v4525_v24, %s2804_s8  ;;  %983 = vrot.lane.b32.xlu0 %v2469_v22, %s2803_s7 }
 0x166   : > { %v3772_v50 = vpop.permute.xlu1 %963  ;;  %v3774_v19 = vpop.permute.xlu0 %961 }
 0x167   : > { %4527 = vst [vmem:[#allocation10_spill] sm:$0xff] %v3772_v50  ;;  %4528 = vst [vmem:[#allocation9_spill] sm:$0xff] %v3774_v19  ;;  %v4532_v19 = vld [vmem:[#allocation28_spill] sm:$0xff] }
 0x168   : > { %1459 = vrot.lane.b32.xlu1 %v2485_v52, %s2807_s6  ;;  %1109 = vrot.lane.b32.xlu0 %v4524_v2, %s2804_s8 }
 0x16a   : > { %v970_v54 = vpop.permute.xlu1 %969  ;;  %v3779_v33 = vpop.permute.xlu0 %965 }
 0x16b   : > { %4529 = vst [vmem:[#allocation15_spill] sm:$0xff] %v3779_v33 }
 0x16c   : > { %1079 = vrot.lane.b32.xlu1 %v2485_v52, %s2804_s8  ;;  %1491 = vrot.lane.b32.xlu0 %v4530_v59, %s2807_s6  ;;  %v2454_v52 = vld [vmem:[%s2890_s30 + $0x79] sm:$0xff] }
 0x16e   : > { %v1066_v22 = vpop.permute.xlu1 %1065  ;;  %v3784_v58 = vpop.permute.xlu0 %971 }
 0x170   : > { %1205 = vrot.lane.b32.xlu1 %v3206_v60, %s2805_s9  ;;  %1111 = vrot.lane.b32.xlu0 %v4530_v59, %s2804_s8  ;;  %v2376_v60 = vld [vmem:[%s2890_s30 + $0x139] sm:$0xff] }
 0x172   : > { %v3790_v2 = vpop.permute.xlu1 %1067  ;;  %v1098_v24 = vpop.permute.xlu0 %1097 }
 0x174   : > { %1207 = vrot.lane.b32.xlu1 %v3203_v29, %s2805_s9  ;;  %1237 = vrot.lane.b32.xlu0 %v3306_v20, %s2805_s9  ;;  %v2471_v20 = vld [vmem:[%s2890_s30 + $0x141] sm:$0xff] }
 0x175   : > { %v2455_v29 = vld [vmem:[%s2890_s30 + $0x81] sm:$0xff] }
 0x176   : > { %v1194_v40 = vpop.permute.xlu1 %1193  ;;  %v3797_v44 = vpop.permute.xlu0 %1099 }
 0x178   : > { %1333 = vrot.lane.b32.xlu1 %v2454_v52, %s2806_s21  ;;  %1239 = vrot.lane.b32.xlu0 %v3303_v53, %s2805_s9  ;;  %v227_v52 = vld [vmem:[%s2890_s30] sm:$0xff] }
 0x179   : > { %v2486_v53 = vld [vmem:[%s2890_s30 + $0x7a] sm:$0xff]  ;;  %v1546_v37 = vsel %vm1545_vm0, %v227_v52, %v4531_v38 }
 0x17a   : > { %v3803_v59 = vpop.permute.xlu1 %1195  ;;  %v1226_v3 = vpop.permute.xlu0 %1225 }
 0x17c   : > { %985 = vrot.lane.b32.xlu1 %v2376_v60, %s2803_s7  ;;  %1365 = vrot.lane.b32.xlu0 %v2376_v60, %s2806_s21  ;;  %v4533_v60 = vld [vmem:[#allocation32_spill] sm:$0xff] }
 0x17d   : > { %v1562_v42 = vsel %vm1545_vm0, %v4533_v60, %v4532_v19 }
 0x17e   : > { %v1322_v26 = vpop.permute.xlu1 %1321  ;;  %v3809_v33 = vpop.permute.xlu0 %1227  ;;  %v1595_v11 = vsel %vm1578_vm1, %v1562_v42, %v3428_v63 }
 0x17f   : > { %v1628_v19 = vsel %vm1611_vm3, %v1595_v11, %v3639_v43  ;;  %v2487_v11 = vld [vmem:[%s2890_s30 + $0x82] sm:$0xff] }
 0x180   : > { %1367 = vrot.lane.b32.xlu1 %v2471_v20, %s2806_s21  ;;  %1335 = vrot.lane.b32.xlu0 %v2455_v29, %s2806_s21  ;;  %v1579_v29 = vsel %vm1578_vm1, %v1546_v37, %v4534_v61  ;;  %v1661_v61 = vsel %vm1644_vm4, %v1628_v19, %v970_v54 }
 0x181   : > { %v1612_v38 = vsel %vm1611_vm3, %v1579_v29, %v3545_v25  ;;  %v1694_v63 = vsel %vm1677_vm5, %v1661_v61, %v1098_v24  ;;  %v228_v25 = vld [vmem:[%s2890_s30 + $0x8] sm:$0xff] }
 0x182   : > { %v3816_v12 = vpop.permute.xlu1 %973  ;;  %v1354_v50 = vpop.permute.xlu0 %1353  ;;  %v1645_v31 = vsel %vm1644_vm4, %v1612_v38, %v3727_v57  ;;  %v1727_v42 = vsel %vm1710_vm6, %v1694_v63, %v1226_v3  ;;  %v2503_v3 = vld [vmem:[%s2890_s30 + $0x142] sm:$0xff]  ;;  %v4538_v63 = vld [vmem:[#allocation31_spill] sm:$0xff] }
 0x183   : > { %v1678_v37 = vsel %vm1677_vm5, %v1645_v31, %v1066_v22  ;;  %v1760_v54 = vsel %vm1743_vm7, %v1727_v42, %v1354_v50  ;;  %v2424_v42 = vld [vmem:[%s2890_s30 + $0x90] sm:$0xff] }
 0x184   : > { %1493 = vrot.lane.b32.xlu1 %v2502_v14, %s2807_s6  ;;  %1461 = vrot.lane.b32.xlu0 %v2486_v53, %s2807_s6  ;;  %v1711_v43 = vsel %vm1710_vm6, %v1678_v37, %v1194_v40  ;;  %v4536_v40 = vld [vmem:[#allocation41_spill] sm:$0xff]  ;;  %v4537_v37 = vld [vmem:[#allocation27_spill] sm:$0xff] }
 0x185   : > { %v1744_v57 = vsel %vm1743_vm7, %v1711_v43, %v1322_v26 }
 0x186   : > { %v1356_v52 = vpop.permute.xlu1 %1355  ;;  %v1324_v60 = vpop.permute.xlu0 %1323 }
 0x188   : > { %1081 = vrot.lane.b32.xlu1 %v2486_v53, %s2804_s8  ;;  %987 = vrot.lane.b32.xlu0 %v2471_v20, %s2803_s7  ;;  %v4535_v20 = vld [vmem:[#allocation24_spill] sm:$0xff] }
 0x189   : > { %v1547_v53 = vsel %vm1545_vm0, %v228_v25, %v4535_v20 }
 0x18a   : > { %v1482_v29 = vpop.permute.xlu1 %1481  ;;  %v1450_v31 = vpop.permute.xlu0 %1449  ;;  %v1580_v26 = vsel %vm1578_vm1, %v1547_v53, %v4536_v40  ;;  %v2457_v40 = vld [vmem:[%s2890_s30 + $0x99] sm:$0xff] }
 0x18b   : > { %v1777_v22 = vsel %vm1776_vm8, %v1744_v57, %v1450_v31  ;;  %v1793_v24 = vsel %vm1776_vm8, %v1760_v54, %v1482_v29  ;;  %v1613_v50 = vsel %vm1611_vm3, %v1580_v26, %v3543_v1 }
 0x18c   : > { %1463 = vrot.lane.b32.xlu1 %v2487_v11, %s2807_s6  ;;  %1113 = vrot.lane.b32.xlu0 %v2502_v14, %s2804_s8  ;;  %v1646_v61 = vsel %vm1644_vm4, %v1613_v50, %v3725_v17  ;;  %v1563_v14 = vsel %vm1545_vm0, %v4538_v63, %v4537_v37  ;;  %v2504_v50 = vld [vmem:[%s2890_s30 + $0x152] sm:$0xff]  ;;  %v4539_v63 = vld [vmem:[#allocation21_spill] sm:$0xff] }
 0x18d   : > { %2599 = vmatprep.mubr.msk.f32.mxu0 %vm1821_vm9, %v1777_v22  ;;  %2623 = vmatprep.mubr.msk.f32.mxu1 %vm1821_vm9, %v1793_v24  ;;  %v1679_v25 = vsel %vm1677_vm5, %v1646_v61, %v3790_v2  ;;  %v1596_v1 = vsel %vm1578_vm1, %v1563_v14, %v3426_v8  ;;  %v2488_v61 = vld [vmem:[%s2890_s30 + $0x92] sm:$0xff]  ;;  %v4540_v14 = vld [vmem:[#allocation25_spill] sm:$0xff] }
 0x18e   : > { %v1070_v38 = vpop.permute.xlu1 %1069  ;;  %v3859_v19 = vpop.permute.xlu0 %975  ;;  %v1712_v43 = vsel %vm1710_vm6, %v1679_v25, %v3803_v59  ;;  %v1629_v17 = vsel %vm1611_vm3, %v1596_v1, %v3637_v45  ;;  %v2425_v59 = vld [vmem:[%s2890_s30 + $0x98] sm:$0xff]  ;;  %v1548_v25 = vsel %vm1545_vm0, %v4540_v14, %v4539_v63  ;;  %v4541_v1 = vld [vmem:[#allocation30_spill] sm:$0xff] }
 0x18f   : > { %v1745_v57 = vsel %vm1743_vm7, %v1712_v43, %v1324_v60  ;;  %v1662_v2 = vsel %vm1644_vm4, %v1629_v17, %v3784_v58  ;;  %v4542_v43 = vld [vmem:[#allocation34_spill] sm:$0xff] }
 0x190   : > { %1083 = vrot.lane.b32.xlu1 %v2487_v11, %s2804_s8  ;;  %1495 = vrot.lane.b32.xlu0 %v2503_v3, %s2807_s6  ;;  %v1695_v8 = vsel %vm1677_vm5, %v1662_v2, %v3797_v44  ;;  %v4543_v17 = vld [vmem:[#allocation46_spill] sm:$0xff] }
 0x191   : > { %v1728_v45 = vsel %vm1710_vm6, %v1695_v8, %v3809_v33  ;;  %v2456_v33 = vld [vmem:[%s2890_s30 + $0x91] sm:$0xff] }
 0x192   : > { %v1452_v54 = vpop.permute.xlu1 %1451  ;;  %v1102_v29 = vpop.permute.xlu0 %1101  ;;  %v1761_v60 = vsel %vm1743_vm7, %v1728_v45, %v1356_v52  ;;  %v2378_v52 = vld [vmem:[%s2890_s30 + $0x151] sm:$0xff] }
 0x193   : > { %v1778_v11 = vsel %vm1776_vm8, %v1745_v57, %v1452_v54  ;;  %v1581_v57 = vsel %vm1578_vm1, %v1548_v25, %v4543_v17 }
 0x194   : > { %1209 = vrot.lane.b32.xlu1 %v2424_v42, %s2805_s9  ;;  %1115 = vrot.lane.b32.xlu0 %v2503_v3, %s2804_s8  ;;  %v1564_v42 = vsel %vm1545_vm0, %v4542_v43, %v4541_v1  ;;  %v1614_v2 = vsel %vm1611_vm3, %v1581_v57, %v3559_v51  ;;  %v4547_v1 = vld [vmem:[#allocation29_spill] sm:$0xff]  ;;  %v2426_v57 = vld [vmem:[%s2890_s30 + $0xa8] sm:$0xff] }
 0x195   : > { %2600 = vmatmul.mubr.msk.f32.vlgmr.msra.gmra.mxu0 %vm1821_vm9, %v1778_v11  ;;  %v1597_v54 = vsel %vm1578_vm1, %v1564_v42, %v3436_v48  ;;  %v4548_v43 = vld [vmem:[#allocation33_spill] sm:$0xff] }
 0x196   : > { %v3890_v31 = vpop.permute.xlu1 %1071  ;;  %v1484_v58 = vpop.permute.xlu0 %1483  ;;  %v1630_v11 = vsel %vm1611_vm3, %v1597_v54, %v3647_v62  ;;  %v2489_v62 = vld [vmem:[%s2890_s30 + $0x9a] sm:$0xff] }
 0x197   : > { %v1794_v44 = vsel %vm1776_vm8, %v1761_v60, %v1484_v58  ;;  %v1663_v60 = vsel %vm1644_vm4, %v1630_v11, %v3816_v12 }
 0x198   : > { %1211 = vrot.lane.b32.xlu1 %v2425_v59, %s2805_s9  ;;  %1241 = vrot.lane.b32.xlu0 %v4498_v13, %s2805_s9  ;;  %v2473_v13 = vld [vmem:[%s2890_s30 + $0x159] sm:$0xff]  ;;  %v1647_v59 = vsel %vm1644_vm4, %v1614_v2, %v3736_v46 }
 0x199   : > { %2624 = vmatmul.mubr.msk.f32.vlgmr.msra.gmra.mxu1 %vm1821_vm9, %v1794_v44  ;;  %v1680_v58 = vsel %vm1677_vm5, %v1647_v59, %v1070_v38  ;;  %v1696_v44 = vsel %vm1677_vm5, %v1663_v60, %v1102_v29 }
 0x19a   : > { %v1198_v22 = vpop.permute.xlu1 %1197  ;;  %v3898_v24 = vpop.permute.xlu0 %1103 }
 0x19b   : > { %v1713_v48 = vsel %vm1710_vm6, %v1680_v58, %v1198_v22  ;;  %v4546_v22 = vld [vmem:[#allocation45_spill] sm:$0xff] }
 0x19c   : > { %1337 = vrot.lane.b32.xlu1 %v2456_v33, %s2806_s21  ;;  %1243 = vrot.lane.b32.xlu0 %v4496_v10, %s2805_s9 }
 0x19e   : > { %v1200_v20 = vpop.permute.xlu1 %1199  ;;  %v1230_v53 = vpop.permute.xlu0 %1229 }
 0x19f   : > { %v1729_v51 = vsel %vm1710_vm6, %v1696_v44, %v1230_v53 }
 0x1a0   : > { %989 = vrot.lane.b32.xlu1 %v2378_v52, %s2803_s7  ;;  %1369 = vrot.lane.b32.xlu0 %v2378_v52, %s2806_s21 }
 0x1a2   : > { %v1326_v26 = vpop.permute.xlu1 %1325  ;;  %v1232_v3 = vpop.permute.xlu0 %1231 }
 0x1a3   : > { %v1746_v33 = vsel %vm1743_vm7, %v1713_v48, %v1326_v26  ;;  %v2505_v26 = vld [vmem:[%s2890_s30 + $0x15a] sm:$0xff] }
 0x1a4   : > { %1371 = vrot.lane.b32.xlu1 %v2473_v13, %s2806_s21  ;;  %1339 = vrot.lane.b32.xlu0 %v2457_v40, %s2806_s21  ;;  %v4544_v40 = vld [vmem:[#allocation23_spill] sm:$0xff] }
 0x1a6   : > { %v3912_v37 = vpop.permute.xlu1 %977  ;;  %v1358_v10 = vpop.permute.xlu0 %1357 }
 0x1a7   : > { %v1762_v46 = vsel %vm1743_vm7, %v1729_v51, %v1358_v10 }
 0x1a8   : > { %1497 = vrot.lane.b32.xlu1 %v2504_v50, %s2807_s6  ;;  %1465 = vrot.lane.b32.xlu0 %v2488_v61, %s2807_s6 }
 0x1aa   : > { %v1360_v8 = vpop.permute.xlu1 %1359  ;;  %v1328_v45 = vpop.permute.xlu0 %1327 }
 0x1ac   : > { %1085 = vrot.lane.b32.xlu1 %v2488_v61, %s2804_s8  ;;  %991 = vrot.lane.b32.xlu0 %v2473_v13, %s2803_s7  ;;  %v4545_v61 = vld [vmem:[#allocation26_spill] sm:$0xff] }
 0x1ad   : > { %v1549_v13 = vsel %vm1545_vm0, %v4545_v61, %v4544_v40  ;;  %v2490_v40 = vld [vmem:[%s2890_s30 + $0xaa] sm:$0xff] }
 0x1ae   : > { %v1486_v52 = vpop.permute.xlu1 %1485  ;;  %v1454_v12 = vpop.permute.xlu0 %1453  ;;  %v1582_v53 = vsel %vm1578_vm1, %v1549_v13, %v4546_v22 }
 0x1af   : > { %v1795_v38 = vsel %vm1776_vm8, %v1762_v46, %v1486_v52  ;;  %v1779_v29 = vsel %vm1776_vm8, %v1746_v33, %v1454_v12  ;;  %v1615_v10 = vsel %vm1611_vm3, %v1582_v53, %v3557_v34  ;;  %v2475_v46 = vld [vmem:[%s2890_s30 + $0x171] sm:$0xff] }
 0x1b0   : > { %1467 = vrot.lane.b32.xlu1 %v2489_v62, %s2807_s6  ;;  %1117 = vrot.lane.b32.xlu0 %v2504_v50, %s2804_s8  ;;  %v1648_v25 = vsel %vm1644_vm4, %v1615_v10, %v3734_v35  ;;  %v1565_v50 = vsel %vm1545_vm0, %v4548_v43, %v4547_v1  ;;  %v2459_v52 = vld [vmem:[%s2890_s30 + $0xb1] sm:$0xff]  ;;  %v1665_v10 = vsel %vm1644_vm4, %v3659_v7, %v3912_v37 }
 0x1b1   : > { %2602 = vmatprep.mubr.msk.f32.mxu0 %vm1821_vm9, %v1779_v29  ;;  %2626 = vmatprep.mubr.msk.f32.mxu1 %vm1821_vm9, %v1795_v38  ;;  %v1681_v42 = vsel %vm1677_vm5, %v1648_v25, %v3890_v31  ;;  %v1598_v34 = vsel %vm1578_vm1, %v1565_v50, %v3434_v9  ;;  %v2506_v29 = vld [vmem:[%s2890_s30 + $0x16a] sm:$0xff] }
 0x1b2   : > { %v1074_v63 = vpop.permute.xlu1 %1073  ;;  %v3957_v14 = vpop.permute.xlu0 %979  ;;  %v1714_v17 = vsel %vm1710_vm6, %v1681_v42, %v1200_v20  ;;  %v1631_v35 = vsel %vm1611_vm3, %v1598_v34, %v3645_v27  ;;  %v2427_v20 = vld [vmem:[%s2890_s30 + $0xb0] sm:$0xff] }
 0x1b3   : > { %v1747_v54 = vsel %vm1743_vm7, %v1714_v17, %v1328_v45  ;;  %v1664_v31 = vsel %vm1644_vm4, %v1631_v35, %v3859_v19  ;;  %v2442_v45 = vld [vmem:[%s2890_s30 + $0x168] sm:$0xff]  ;;  %v2491_v42 = vld [vmem:[%s2890_s30 + $0xb2] sm:$0xff] }
 0x1b4   : > { %1087 = vrot.lane.b32.xlu1 %v2489_v62, %s2804_s8  ;;  %1499 = vrot.lane.b32.xlu0 %v2505_v26, %s2807_s6  ;;  %v1697_v9 = vsel %vm1677_vm5, %v1664_v31, %v3898_v24  ;;  %v2458_v24 = vld [vmem:[%s2890_s30 + $0xa9] sm:$0xff]  ;;  %v2507_v17 = vld [vmem:[%s2890_s30 + $0x172] sm:$0xff] }
 0x1b5   : > { %v1730_v27 = vsel %vm1710_vm6, %v1697_v9, %v1232_v3  ;;  %v2443_v3 = vld [vmem:[%s2890_s30 + $0x170] sm:$0xff]  ;;  %v2428_v31 = vld [vmem:[%s2890_s30 + $0xc0] sm:$0xff] }
 0x1b6   : > { %v1456_v2 = vpop.permute.xlu1 %1455  ;;  %v1106_v11 = vpop.permute.xlu0 %1105  ;;  %v1763_v19 = vsel %vm1743_vm7, %v1730_v27, %v1360_v8  ;;  %v2380_v8 = vld [vmem:[%s2890_s30 + $0x169] sm:$0xff] }
 0x1b7   : > { %v1780_v59 = vsel %vm1776_vm8, %v1747_v54, %v1456_v2  ;;  %v1698_v1 = vsel %vm1677_vm5, %v1665_v10, %v1106_v11  ;;  %v1650_v54 = vsel %vm1644_vm4, %v3567_v15, %v3742_v23  ;;  %v1651_v10 = vsel %vm1644_vm4, %v3583_v36, %v3752_v21 }
 0x1b8   : > { %1213 = vrot.lane.b32.xlu1 %v2426_v57, %s2805_s9  ;;  %1119 = vrot.lane.b32.xlu0 %v2505_v26, %s2804_s8  ;;  %v1649_v26 = vsel %vm1644_vm4, %v3571_v56, %v3744_v30 }
 0x1b9   : > { %2603 = vmatmul.mubr.msk.f32.gmra.mxu0 %vm1821_vm9, %v1780_v59  ;;  %v1682_v25 = vsel %vm1677_vm5, %v1649_v26, %v1074_v63 }
 0x1ba   : > { %v1076_v60 = vpop.permute.xlu1 %1075  ;;  %v1488_v58 = vpop.permute.xlu0 %1487 }
 0x1bb   : > { %v1796_v44 = vsel %vm1776_vm8, %v1763_v19, %v1488_v58  ;;  %v1683_v2 = vsel %vm1677_vm5, %v1650_v54, %v1076_v60  ;;  %v2429_v19 = vld [vmem:[%s2890_s30 + $0xc8] sm:$0xff]  ;;  %v2444_v60 = vld [vmem:[%s2890_s30 + $0x180] sm:$0xff] }
 0x1bc   : > { %1215 = vrot.lane.b32.xlu1 %v2427_v20, %s2805_s9  ;;  %1245 = vrot.lane.b32.xlu0 %v2442_v45, %s2805_s9  ;;  %v1666_v20 = vsel %vm1644_vm4, %v3655_v4, %v3957_v14 }
 0x1bd   : > { %2627 = vmatmul.mubr.msk.f32.gmra.mxu1 %vm1821_vm9, %v1796_v44 }
 0x1be   : > { %v1202_v48 = vpop.permute.xlu1 %1201  ;;  %v1108_v51 = vpop.permute.xlu0 %1107 }
 0x1bf   : > { %v1715_v43 = vsel %vm1710_vm6, %v1682_v25, %v1202_v48  ;;  %v1699_v23 = vsel %vm1677_vm5, %v1666_v20, %v1108_v51  ;;  %v2430_v20 = vld [vmem:[%s2890_s30 + $0xd8] sm:$0xff] }
 0x1c0   : > { %1341 = vrot.lane.b32.xlu1 %v2458_v24, %s2806_s21  ;;  %1247 = vrot.lane.b32.xlu0 %v2443_v3, %s2805_s9  ;;  %v2460_v24 = vld [vmem:[%s2890_s30 + $0xc1] sm:$0xff] }
 0x1c1   : > { %v2445_v3 = vld [vmem:[%s2890_s30 + $0x188] sm:$0xff] }
 0x1c2   : > { %v1204_v62 = vpop.permute.xlu1 %1203  ;;  %v1234_v33 = vpop.permute.xlu0 %1233 }
 0x1c3   : > { %v1731_v50 = vsel %vm1710_vm6, %v1698_v1, %v1234_v33  ;;  %v1716_v11 = vsel %vm1710_vm6, %v1683_v2, %v1204_v62 }
 0x1c4   : > { %993 = vrot.lane.b32.xlu1 %v2380_v8, %s2803_s7  ;;  %1373 = vrot.lane.b32.xlu0 %v2380_v8, %s2806_s21  ;;  %v2382_v8 = vld [vmem:[%s2890_s30 + $0x181] sm:$0xff] }
 0x1c6   : > { %v1330_v12 = vpop.permute.xlu1 %1329  ;;  %v1236_v38 = vpop.permute.xlu0 %1235 }
 0x1c7   : > { %v1748_v56 = vsel %vm1743_vm7, %v1715_v43, %v1330_v12  ;;  %v1732_v45 = vsel %vm1710_vm6, %v1699_v23, %v1236_v38 }
 0x1c8   : > { %1375 = vrot.lane.b32.xlu1 %v2475_v46, %s2806_s21  ;;  %1343 = vrot.lane.b32.xlu0 %v2459_v52, %s2806_s21  ;;  %v2461_v52 = vld [vmem:[%s2890_s30 + $0xc9] sm:$0xff] }
 0x1ca   : > { %v4004_v61 = vpop.permute.xlu1 %981  ;;  %v1362_v13 = vpop.permute.xlu0 %1361 }
 0x1cb   : > { %v1764_v30 = vsel %vm1743_vm7, %v1731_v50, %v1362_v13  ;;  %v1667_v25 = vsel %vm1644_vm4, %v3671_v49, %v4004_v61 }
 0x1cc   : > { %1501 = vrot.lane.b32.xlu1 %v2506_v29, %s2807_s6  ;;  %1469 = vrot.lane.b32.xlu0 %v2490_v40, %s2807_s6 }
 0x1ce   : > { %v1364_v22 = vpop.permute.xlu1 %1363  ;;  %v1332_v53 = vpop.permute.xlu0 %1331 }
 0x1cf   : > { %v1749_v59 = vsel %vm1743_vm7, %v1716_v11, %v1332_v53  ;;  %v1765_v58 = vsel %vm1743_vm7, %v1732_v45, %v1364_v22  ;;  %v2447_v45 = vld [vmem:[%s2890_s30 + $0x1a0] sm:$0xff] }
 0x1d0   : > { %1089 = vrot.lane.b32.xlu1 %v2490_v40, %s2804_s8  ;;  %995 = vrot.lane.b32.xlu0 %v2475_v46, %s2803_s7  ;;  %v2477_v46 = vld [vmem:[%s2890_s30 + $0x189] sm:$0xff] }
 0x1d1   : > { %v2492_v40 = vld [vmem:[%s2890_s30 + $0xc2] sm:$0xff] }
 0x1d2   : > { %v1490_v34 = vpop.permute.xlu1 %1489  ;;  %v1458_v7 = vpop.permute.xlu0 %1457 }
 0x1d3   : > { %v1797_v37 = vsel %vm1776_vm8, %v1764_v30, %v1490_v34  ;;  %v1781_v63 = vsel %vm1776_vm8, %v1748_v56, %v1458_v7  ;;  %v2509_v34 = vld [vmem:[%s2890_s30 + $0x18a] sm:$0xff] }
 0x1d4   : > { %1471 = vrot.lane.b32.xlu1 %v2491_v42, %s2807_s6  ;;  %1121 = vrot.lane.b32.xlu0 %v2506_v29, %s2804_s8  ;;  %v2508_v29 = vld [vmem:[%s2890_s30 + $0x182] sm:$0xff]  ;;  %v2493_v7 = vld [vmem:[%s2890_s30 + $0xca] sm:$0xff] }
 0x1d5   : > { %2605 = vmatprep.mubr.msk.f32.mxu0 %vm1821_vm9, %v1781_v63  ;;  %2629 = vmatprep.mubr.msk.f32.mxu1 %vm1821_vm9, %v1797_v37 }
 0x1d6   : > { %v1078_v57 = vpop.permute.xlu1 %1077  ;;  %v4030_v35 = vpop.permute.xlu0 %983 }
 0x1d7   : > { %v1684_v1 = vsel %vm1677_vm5, %v1651_v10, %v1078_v57 }
 0x1d8   : > { %1091 = vrot.lane.b32.xlu1 %v2491_v42, %s2804_s8  ;;  %1503 = vrot.lane.b32.xlu0 %v2507_v17, %s2807_s6 }
 0x1da   : > { %v1460_v9 = vpop.permute.xlu1 %1459  ;;  %v1110_v27 = vpop.permute.xlu0 %1109 }
 0x1db   : > { %v1782_v15 = vsel %vm1776_vm8, %v1749_v59, %v1460_v9  ;;  %v1700_v43 = vsel %vm1677_vm5, %v1667_v25, %v1110_v27  ;;  %v1668_v59 = vsel %vm1644_vm4, %v3667_v18, %v4030_v35  ;;  %v2446_v27 = vld [vmem:[%s2890_s30 + $0x198] sm:$0xff] }
 0x1dc   : > { %1217 = vrot.lane.b32.xlu1 %v2428_v31, %s2805_s9  ;;  %1123 = vrot.lane.b32.xlu0 %v2507_v17, %s2804_s8  ;;  %v1652_v17 = vsel %vm1644_vm4, %v3579_v47, %v3750_v28 }
 0x1dd   : > { %2606 = vmatmul.mubr.msk.f32.gmra.mxu0 %vm1821_vm9, %v1782_v15 }
 0x1de   : > { %v1080_v4 = vpop.permute.xlu1 %1079  ;;  %v1492_v14 = vpop.permute.xlu0 %1491 }
 0x1df   : > { %v1798_v44 = vsel %vm1776_vm8, %v1765_v58, %v1492_v14  ;;  %v1685_v57 = vsel %vm1677_vm5, %v1652_v17, %v1080_v4  ;;  %v2478_v4 = vld [vmem:[%s2890_s30 + $0x199] sm:$0xff] }
 0x1e0   : > { %1219 = vrot.lane.b32.xlu1 %v2429_v19, %s2805_s9  ;;  %1249 = vrot.lane.b32.xlu0 %v2444_v60, %s2805_s9  ;;  %v2431_v19 = vld [vmem:[%s2890_s30 + $0xe0] sm:$0xff] }
 0x1e1   : > { %2630 = vmatmul.mubr.msk.f32.gmra.mxu1 %vm1821_vm9, %v1798_v44  ;;  %v2462_v14 = vld [vmem:[%s2890_s30 + $0xd9] sm:$0xff] }
 0x1e2   : > { %v1206_v48 = vpop.permute.xlu1 %1205  ;;  %v1112_v51 = vpop.permute.xlu0 %1111 }
 0x1e3   : > { %v1717_v50 = vsel %vm1710_vm6, %v1684_v1, %v1206_v48  ;;  %v1701_v28 = vsel %vm1677_vm5, %v1668_v59, %v1112_v51  ;;  %v2463_v48 = vld [vmem:[%s2890_s30 + $0xe1] sm:$0xff] }
 0x1e4   : > { %1345 = vrot.lane.b32.xlu1 %v2460_v24, %s2806_s21  ;;  %1251 = vrot.lane.b32.xlu0 %v2445_v3, %s2805_s9  ;;  %v2479_v3 = vld [vmem:[%s2890_s30 + $0x1a1] sm:$0xff] }
 0x1e6   : > { %v1208_v62 = vpop.permute.xlu1 %1207  ;;  %v1238_v33 = vpop.permute.xlu0 %1237 }
 0x1e7   : > { %v1733_v42 = vsel %vm1710_vm6, %v1700_v43, %v1238_v33  ;;  %v1718_v54 = vsel %vm1710_vm6, %v1685_v57, %v1208_v62  ;;  %v2510_v62 = vld [vmem:[%s2890_s30 + $0x19a] sm:$0xff] }
 0x1e8   : > { %997 = vrot.lane.b32.xlu1 %v2382_v8, %s2803_s7  ;;  %1377 = vrot.lane.b32.xlu0 %v2382_v8, %s2806_s21  ;;  %v2494_v33 = vld [vmem:[%s2890_s30 + $0xda] sm:$0xff] }
 0x1ea   : > { %v1334_v12 = vpop.permute.xlu1 %1333  ;;  %v1240_v38 = vpop.permute.xlu0 %1239 }
 0x1eb   : > { %v1750_v36 = vsel %vm1743_vm7, %v1717_v50, %v1334_v12  ;;  %v1734_v9 = vsel %vm1710_vm6, %v1701_v28, %v1240_v38  ;;  %v2511_v12 = vld [vmem:[%s2890_s30 + $0x1a2] sm:$0xff] }
 0x1ec   : > { %1379 = vrot.lane.b32.xlu1 %v2477_v46, %s2806_s21  ;;  %1347 = vrot.lane.b32.xlu0 %v2461_v52, %s2806_s21  ;;  %v2495_v38 = vld [vmem:[%s2890_s30 + $0xe2] sm:$0xff]  ;;  %s208_s30 = sand.u32 1, %s2782_s13  }
 0x1ed   : > { %s4357_s15 = scalar_lea.sflag [#allocation3], %s208_s30 }
 0x1ee   : > { %v4070_v13 = vpop.permute.xlu1 %985  ;;  %v1366_v22 = vpop.permute.xlu0 %1365 }
 0x1ef   : > { %v1766_v21 = vsel %vm1743_vm7, %v1733_v42, %v1366_v22  ;;  %v1653_v22 = vsel %vm1644_vm4, %v3595_v39, %v3758_v5 }
 0x1f0   : > { %1505 = vrot.lane.b32.xlu1 %v2508_v29, %s2807_s6  ;;  %1473 = vrot.lane.b32.xlu0 %v2492_v40, %s2807_s6 }
 0x1f2   : > { %v1368_v53 = vpop.permute.xlu1 %1367  ;;  %v1336_v26 = vpop.permute.xlu0 %1335 }
 0x1f3   : > { %v1751_v2 = vsel %vm1743_vm7, %v1718_v54, %v1336_v26  ;;  %v1767_v18 = vsel %vm1743_vm7, %v1734_v9, %v1368_v53  ;;  %v1669_v53 = vsel %vm1644_vm4, %v3683_v0, %v4070_v13 }
 0x1f4   : > { %999 = vrot.lane.b32.xlu1 %v2477_v46, %s2803_s7  ;;  %967 = vrot.lane.b32.xlu0 %v2461_v52, %s2803_s7  ;;  %s2318_s7 = sshll.u32 %s208_s30, 8 }
 0x1f5   : > { %s4217_s10 = scalar_lea.vmem [#allocation2], %s2318_s7 }
 0x1f6   : > { %v1494_v56 = vpop.permute.xlu1 %1493  ;;  %v1462_v49 = vpop.permute.xlu0 %1461  ;;  %s2197_s18 = sshll.u32 %s4217_s10, 4  ;;  %s4351_s18 = int_to_ptr.vmem [resolvable:$true] %s2197_s18 }
 0x1f7   : > { %v1799_v61 = vsel %vm1776_vm8, %v1766_v21, %v1494_v56  ;;  %v1783_v30 = vsel %vm1776_vm8, %v1750_v36, %v1462_v49  ;;  %v1654_v21 = vsel %vm1644_vm4, %v3591_v41, %v3756_v55  ;;  %s2722_s26 = scalar_lea.vmem %s4351_s18, 4096  ;;  %p2729_p1 = scmp.lt.s32.totalorder %s4351_s18, %s2727_s28 }
 0x1f8   : > { %1125 = vrot.lane.b32.xlu1 %v2508_v29, %s2804_s8  ;;  %1093 = vrot.lane.b32.xlu0 %v2492_v40, %s2804_s8  ;;  %p2723_p12 = scmp.ne.s32.totalorder %s4351_s18, %s2722_s26  ;;  %p2730_p2 = scmp.lt.s32.totalorder %s2728_s29, %s2722_s26 }
 0x1f9   : > { %2608 = vmatprep.mubr.msk.f32.mxu0 %vm1821_vm9, %v1783_v30  ;;  %2632 = vmatprep.mubr.msk.f32.mxu1 %vm1821_vm9, %v1799_v61 }
 0x1fa   : > { %v1082_v37 = vpop.permute.xlu1 %1081  ;;  %v4096_v63 = vpop.permute.xlu0 %987  ;;  %p2724_p13 = pnand %p2723_p12, %p2870_p4  ;;  %p2731_p3 = por %p2730_p2, %p2729_p1 }
 0x1fb   : > { %v1686_v26 = vsel %vm1677_vm5, %v1653_v22, %v1082_v37 }
 0x1fc   : > { %1507 = vrot.lane.b32.xlu1 %v2509_v34, %s2807_s6  ;;  %1475 = vrot.lane.b32.xlu0 %v2493_v7, %s2807_s6  ;;  %p2725_p0 = pneg %p2724_p13 }
 0x1fe   : > { %v1464_v11 = vpop.permute.xlu1 %1463  ;;  %v1114_v31 = vpop.permute.xlu0 %1113  ;;  %p2732_p5 = pnand %p2731_p3, %p2725_p0 }
 0x1ff   : > { %v1784_v47 = vsel %vm1776_vm8, %v1751_v2, %v1464_v11  ;;  %v1702_v10 = vsel %vm1677_vm5, %v1669_v53, %v1114_v31 }
 0x200   : > { %1127 = vrot.lane.b32.xlu1 %v2509_v34, %s2804_s8  ;;  %1095 = vrot.lane.b32.xlu0 %v2493_v7, %s2804_s8  ;;  %v1670_v7 = vsel %vm1644_vm4, %v3679_v6, %v4096_v63 }
 0x201   : > { %2609 = vmatmul.mubr.msk.f32.gmra.mxu0 %vm1821_vm9, %v1784_v47 }
 0x202   : > { %v1084_v35 = vpop.permute.xlu1 %1083  ;;  %v1496_v15 = vpop.permute.xlu0 %1495 }
 0x203   : > { %v1800_v23 = vsel %vm1776_vm8, %v1767_v18, %v1496_v15  ;;  %v1687_v56 = vsel %vm1677_vm5, %v1654_v21, %v1084_v35  ;;  %v1655_v18 = vsel %vm1644_vm4, %v3607_v16, %v3766_v32  ;;  %v4549_v35 = vld [vmem:[#allocation44_spill] sm:$0xff] }
 0x204   : > { %1253 = vrot.lane.b32.xlu1 %v2446_v27, %s2805_s9  ;;  %1221 = vrot.lane.b32.xlu0 %v2430_v20, %s2805_s9 }
 0x205   : > { %2633 = vmatmul.mubr.msk.f32.gmra.mxu1 %vm1821_vm9, %v1800_v23 }
 0x206   : > { %v1210_v60 = vpop.permute.xlu1 %1209  ;;  %v1116_v58 = vpop.permute.xlu0 %1115 }
 0x207   : > { %v1719_v25 = vsel %vm1710_vm6, %v1686_v26, %v1210_v60  ;;  %v1703_v17 = vsel %vm1677_vm5, %v1670_v7, %v1116_v58 }
 0x208   : > { %1255 = vrot.lane.b32.xlu1 %v2447_v45, %s2805_s9  ;;  %1223 = vrot.lane.b32.xlu0 %v2431_v19, %s2805_s9 }
 0x20a   : > { %v1212_v44 = vpop.permute.xlu1 %1211  ;;  %v1242_v24 = vpop.permute.xlu0 %1241 }
 0x20b   : > { %v1735_v1 = vsel %vm1710_vm6, %v1702_v10, %v1242_v24  ;;  %v1720_v49 = vsel %vm1710_vm6, %v1687_v56, %v1212_v44 }
 0x20c   : > { %1381 = vrot.lane.b32.xlu1 %v2478_v4, %s2806_s21  ;;  %1349 = vrot.lane.b32.xlu0 %v2462_v14, %s2806_s21 }
 0x20e   : > { %v1338_v51 = vpop.permute.xlu1 %1337  ;;  %v1244_v8 = vpop.permute.xlu0 %1243 }
 0x20f   : > { %v1752_v43 = vsel %vm1743_vm7, %v1719_v25, %v1338_v51  ;;  %v1736_v41 = vsel %vm1710_vm6, %v1703_v17, %v1244_v8  ;;  %v4551_v51 = vld [vmem:[#allocation35_spill] sm:$0xff] }
 0x210   : > { %1383 = vrot.lane.b32.xlu1 %v2479_v3, %s2806_s21  ;;  %1351 = vrot.lane.b32.xlu0 %v2463_v48, %s2806_s21  ;;  %v4550_v48 = vld [vmem:[#allocation16_spill] sm:$0xff] }
 0x211   : > { %v1656_v8 = vsel %vm1644_vm4, %v4551_v51, %v4550_v48 }
 0x212   : > { %v990_v46 = vpop.permute.xlu1 %989  ;;  %v1370_v52 = vpop.permute.xlu0 %1369 }
 0x213   : > { %v1768_v39 = vsel %vm1743_vm7, %v1735_v1, %v1370_v52  ;;  %v1671_v15 = vsel %vm1644_vm4, %v4549_v35, %v990_v46 }
 0x214   : > { %1509 = vrot.lane.b32.xlu1 %v2510_v62, %s2807_s6  ;;  %1477 = vrot.lane.b32.xlu0 %v2494_v33, %s2807_s6 }
 0x216   : > { %v1372_v29 = vpop.permute.xlu1 %1371  ;;  %v1340_v40 = vpop.permute.xlu0 %1339 }
 0x217   : > { %v1753_v61 = vsel %vm1743_vm7, %v1720_v49, %v1340_v40  ;;  %v1769_v55 = vsel %vm1743_vm7, %v1736_v41, %v1372_v29 }
 0x218   : > { %1511 = vrot.lane.b32.xlu1 %v2511_v12, %s2807_s6  ;;  %1479 = vrot.lane.b32.xlu0 %v2495_v38, %s2807_s6  ;;  %v4552_v38 = vld [vmem:[#allocation38_spill] sm:$0xff] }
 0x21a   : > { %v1498_v5 = vpop.permute.xlu1 %1497  ;;  %v1466_v50 = vpop.permute.xlu0 %1465 }
 0x21b   : > { %v1801_v0 = vsel %vm1776_vm8, %v1768_v39, %v1498_v5  ;;  %v1785_v13 = vsel %vm1776_vm8, %v1752_v43, %v1466_v50 }
 0x21c   : > { %2611 = vmatprep.mubr.msk.f32.mxu0 %vm1821_vm9, %v1785_v13  ;;  %2635 = vmatprep.mubr.msk.f32.mxu1 %vm1821_vm9, %v1801_v0  ;;  %v4214_v0 = vld [vmem:[%s4405_s2] ss:$0 sm:$0xff] }
 0x21e   : > { %v1086_v42 = vpop.permute.xlu1 %1085  ;;  %v992_v36 = vpop.permute.xlu0 %991 }
 0x21f   : > { %v1688_v23 = vsel %vm1677_vm5, %v1655_v18, %v1086_v42  ;;  %v1672_v29 = vsel %vm1644_vm4, %v4552_v38, %v992_v36 }
 0x222   : > { %v1468_v30 = vpop.permute.xlu1 %1467  ;;  %v1118_v34 = vpop.permute.xlu0 %1117 }
 0x223   : > { %v1786_v37 = vsel %vm1776_vm8, %v1753_v61, %v1468_v30  ;;  %v1704_v45 = vsel %vm1677_vm5, %v1671_v15, %v1118_v34 }
 0x224   : > { %2612 = vmatmul.mubr.msk.f32.gmra.mxu0 %vm1821_vm9, %v1786_v37 }
 0x226   : > { %v1088_v57 = vpop.permute.xlu1 %1087  ;;  %v1500_v54 = vpop.permute.xlu0 %1499 }
 0x227   : > { %v1802_v2 = vsel %vm1776_vm8, %v1769_v55, %v1500_v54  ;;  %v1689_v62 = vsel %vm1677_vm5, %v1656_v8, %v1088_v57  ;;  %v4553_v57 = vld [vmem:[#allocation9_spill] sm:$0xff]  ;;  %v4554_v54 = vld [vmem:[#allocation14_spill] sm:$0xff] }
 0x228   : > { %2636 = vmatmul.mubr.msk.f32.gmra.mxu1 %vm1821_vm9, %v1802_v2  ;;  %v1657_v2 = vsel %vm1644_vm4, %v4554_v54, %v4553_v57 }
 0x22a   : > { %v1214_v11 = vpop.permute.xlu1 %1213  ;;  %v1120_v31 = vpop.permute.xlu0 %1119 }
 0x22b   : > { %v1721_v19 = vsel %vm1710_vm6, %v1688_v23, %v1214_v11  ;;  %v1705_v22 = vsel %vm1677_vm5, %v1672_v29, %v1120_v31  ;;  %v4555_v11 = vld [vmem:[#allocation40_spill] sm:$0xff] }
 0x22e   : > { %v1216_v59 = vpop.permute.xlu1 %1215  ;;  %v1246_v6 = vpop.permute.xlu0 %1245 }
 0x22f   : > { %v1737_v60 = vsel %vm1710_vm6, %v1704_v45, %v1246_v6  ;;  %v1722_v33 = vsel %vm1710_vm6, %v1689_v62, %v1216_v59 }
 0x232   : > { %v1342_v63 = vpop.permute.xlu1 %1341  ;;  %v1248_v47 = vpop.permute.xlu0 %1247 }
 0x233   : > { %v1754_v58 = vsel %vm1743_vm7, %v1721_v19, %v1342_v63  ;;  %v1738_v53 = vsel %vm1710_vm6, %v1705_v22, %v1248_v47 }
 0x236   : > { %v4174_v28 = vpop.permute.xlu1 %993  ;;  %v1374_v9 = vpop.permute.xlu0 %1373 }
 0x237   : > { %v1770_v4 = vsel %vm1743_vm7, %v1737_v60, %v1374_v9  ;;  %v1673_v31 = vsel %vm1644_vm4, %v4555_v11, %v4174_v28  ;;  %v4556_v60 = vld [vmem:[#allocation10_spill] sm:$0xff] }
 0x238   : > { %v4562_v11 = vld [vmem:[#allocation6_spill] sm:$0xff] }
 0x23a   : > { %v1376_v27 = vpop.permute.xlu1 %1375  ;;  %v1344_v20 = vpop.permute.xlu0 %1343 }
 0x23b   : > { %v1755_v46 = vsel %vm1743_vm7, %v1722_v33, %v1344_v20  ;;  %v1771_v26 = vsel %vm1743_vm7, %v1738_v53, %v1376_v27 }
 0x23e   : > { %v1502_v14 = vpop.permute.xlu1 %1501  ;;  %v1470_v44 = vpop.permute.xlu0 %1469 }
 0x23f   : > { %v1803_v24 = vsel %vm1776_vm8, %v1770_v4, %v1502_v14  ;;  %v1787_v16 = vsel %vm1776_vm8, %v1754_v58, %v1470_v44  ;;  %v4557_v58 = vld [vmem:[#allocation36_spill] sm:$0xff]  ;;  %v4558_v14 = vld [vmem:[#allocation39_spill] sm:$0xff] }
 0x240   : > { %2614 = vmatprep.mubr.msk.f32.mxu0 %vm1821_vm9, %v1787_v16  ;;  %2638 = vmatprep.mubr.msk.f32.mxu1 %vm1821_vm9, %v1803_v24  ;;  %v1658_v4 = vsel %vm1644_vm4, %v4557_v58, %v4556_v60 }
 0x242   : > { %v1090_v32 = vpop.permute.xlu1 %1089  ;;  %v4191_v3 = vpop.permute.xlu0 %995 }
 0x243   : > { %v1690_v59 = vsel %vm1677_vm5, %v1657_v2, %v1090_v32  ;;  %v1674_v44 = vsel %vm1644_vm4, %v4558_v14, %v4191_v3 }
 0x246   : > { %v1472_v52 = vpop.permute.xlu1 %1471  ;;  %v1122_v12 = vpop.permute.xlu0 %1121 }
 0x247   : > { %v1788_v40 = vsel %vm1776_vm8, %v1755_v46, %v1472_v52  ;;  %v1706_v6 = vsel %vm1677_vm5, %v1673_v31, %v1122_v12 }
 0x248   : > { %2615 = vmatmul.mubr.msk.f32.gmra.mxu0 %vm1821_vm9, %v1788_v40 }
 0x24a   : > { %v1092_v10 = vpop.permute.xlu1 %1091  ;;  %v1504_v25 = vpop.permute.xlu0 %1503 }
 0x24b   : > { %v1804_v1 = vsel %vm1776_vm8, %v1771_v26, %v1504_v25  ;;  %v1691_v24 = vsel %vm1677_vm5, %v1658_v4, %v1092_v10 }
 0x24c   : > { %2639 = vmatmul.mubr.msk.f32.gmra.mxu1 %vm1821_vm9, %v1804_v1 }
 0x24e   : > { %v1218_v43 = vpop.permute.xlu1 %1217  ;;  %v1124_v39 = vpop.permute.xlu0 %1123 }
 0x24f   : > { %v1723_v63 = vsel %vm1710_vm6, %v1690_v59, %v1218_v43  ;;  %v1707_v16 = vsel %vm1677_vm5, %v1674_v44, %v1124_v39  ;;  %v4563_v59 = vld [vmem:[#allocation37_spill] sm:$0xff] }
 0x252   : > { %v1220_v5 = vpop.permute.xlu1 %1219  ;;  %v1250_v50 = vpop.permute.xlu0 %1249 }
 0x253   : > { %v1739_v47 = vsel %vm1710_vm6, %v1706_v6, %v1250_v50  ;;  %v1724_v32 = vsel %vm1710_vm6, %v1691_v24, %v1220_v5 }
 0x255   : > { %v2601_v13 = vpop.f32.mrf.mxu0 }
 0x256   : > { %v1994_v42 = vadd.f32 %v2601_v13, %v4214_v0  ;;  %v1346_v36 = vpop.permute.xlu1 %1345  ;;  %v1252_v21 = vpop.permute.xlu0 %1251 }
 0x257   : > { %v1988_v56 = vpop.f32.mrf.mxu0  ;;  %v1756_v9 = vsel %vm1743_vm7, %v1723_v63, %v1346_v36  ;;  %v1740_v48 = vsel %vm1710_vm6, %v1707_v16, %v1252_v21  ;;  %v4559_v21 = vld [vmem:[#allocation15_spill] sm:$0xff] }
 0x258   : > { %2148 = vst [vmem:[%s4217_s10 + $0x8] sm:$0xff] %v1994_v42  ;;  %v1989_v49 = vadd.f32 %v4214_v0, %v1988_v56  ;;  %v4560_v56 = vld [vmem:[#allocation43_spill] sm:$0xff] }
 0x259   : > { %v2625_v61 = vpop.f32.mrf.mxu1 }
 0x25a   : > { %2147 = vst [vmem:[%s4217_s10] sm:$0xff] %v1989_v49  ;;  %v2074_v30 = vadd.f32 %v2625_v61, %v4214_v0  ;;  %v4223_v34 = vpop.permute.xlu1 %997  ;;  %v1378_v7 = vpop.permute.xlu0 %1377  ;;  %v1659_v49 = vsel %vm1644_vm4, %v4560_v56, %v4559_v21  ;;  %v4561_v61 = vld [vmem:[#allocation5_spill] sm:$0xff] }
 0x25b   : > { %v2068_v37 = vpop.f32.mrf.mxu1  ;;  %v1772_v27 = vsel %vm1743_vm7, %v1739_v47, %v1378_v7 }
 0x25c   : > { %2164 = vst [vmem:[%s4217_s10 + $0x88] sm:$0xff] %v2074_v30  ;;  %v2069_v17 = vadd.f32 %v4214_v0, %v2068_v37  ;;  %v1675_v30 = vsel %vm1644_vm4, %v4561_v61, %v4223_v34 }
 0x25e   : > { %2163 = vst [vmem:[%s4217_s10 + $0x80] sm:$0xff] %v2069_v17  ;;  %v1380_v41 = vpop.permute.xlu1 %1379  ;;  %v1348_v55 = vpop.permute.xlu0 %1347 }
 0x25f   : > { %v1773_v51 = vsel %vm1743_vm7, %v1740_v48, %v1380_v41  ;;  %v1757_v8 = vsel %vm1743_vm7, %v1724_v32, %v1348_v55 }
 0x262   : > { %v1506_v20 = vpop.permute.xlu1 %1505  ;;  %v1474_v18 = vpop.permute.xlu0 %1473 }
 0x263   : > { %v1805_v35 = vsel %vm1776_vm8, %v1772_v27, %v1506_v20  ;;  %v1789_v15 = vsel %vm1776_vm8, %v1756_v9, %v1474_v18 }
 0x264   : > { %2617 = vmatprep.mubr.msk.f32.mxu0 %vm1821_vm9, %v1789_v15  ;;  %2641 = vmatprep.mubr.msk.f32.mxu1 %vm1821_vm9, %v1805_v35 }
 0x266   : > { %v1000_v28 = vpop.permute.xlu1 %999  ;;  %v968_v23 = vpop.permute.xlu0 %967 }
 0x267   : > { %v1676_v31 = vsel %vm1644_vm4, %v4562_v11, %v1000_v28  ;;  %v1660_v34 = vsel %vm1644_vm4, %v4563_v59, %v968_v23 }
 0x26a   : > { %v1126_v45 = vpop.permute.xlu1 %1125  ;;  %v1094_v19 = vpop.permute.xlu0 %1093 }
 0x26b   : > { %v1708_v7 = vsel %vm1677_vm5, %v1675_v30, %v1126_v45  ;;  %v1692_v37 = vsel %vm1677_vm5, %v1659_v49, %v1094_v19 }
 0x26e   : > { %v1508_v62 = vpop.permute.xlu1 %1507  ;;  %v1476_v33 = vpop.permute.xlu0 %1475 }
 0x26f   : > { %v1806_v46 = vsel %vm1776_vm8, %v1773_v51, %v1508_v62  ;;  %v1790_v3 = vsel %vm1776_vm8, %v1757_v8, %v1476_v33 }
 0x270   : > { %2618 = vmatmul.mubr.msk.f32.gmra.mxu0 %vm1821_vm9, %v1790_v3  ;;  %2642 = vmatmul.mubr.msk.f32.gmra.mxu1 %vm1821_vm9, %v1806_v46 }
 0x272   : > { %v1128_v52 = vpop.permute.xlu1 %1127  ;;  %v1096_v12 = vpop.permute.xlu0 %1095 }
 0x273   : > { %v1709_v47 = vsel %vm1677_vm5, %v1676_v31, %v1128_v52  ;;  %v1693_v9 = vsel %vm1677_vm5, %v1660_v34, %v1096_v12 }
 0x276   : > { %v1254_v38 = vpop.permute.xlu1 %1253  ;;  %v1222_v29 = vpop.permute.xlu0 %1221 }
 0x277   : > { %v1741_v17 = vsel %vm1710_vm6, %v1708_v7, %v1254_v38  ;;  %v1725_v41 = vsel %vm1710_vm6, %v1692_v37, %v1222_v29 }
 0x279   : > { %v2604_v40 = vpop.f32.mrf.mxu0 }
 0x27a   : > { %v2004_v22 = vadd.f32 %v2604_v40, %v4214_v0  ;;  %v1256_v53 = vpop.permute.xlu1 %1255  ;;  %v1224_v26 = vpop.permute.xlu0 %1223 }
 0x27b   : > { %v1998_v10 = vpop.f32.mrf.mxu0  ;;  %v1742_v27 = vsel %vm1710_vm6, %v1709_v47, %v1256_v53  ;;  %v1726_v20 = vsel %vm1710_vm6, %v1693_v9, %v1224_v26 }
 0x27c   : > { %2150 = vst [vmem:[%s4217_s10 + $0x18] sm:$0xff] %v2004_v22  ;;  %v1999_v25 = vadd.f32 %v4214_v0, %v1998_v10 }
 0x27d   : > { %v2628_v1 = vpop.f32.mrf.mxu1 }
 0x27e   : > { %2149 = vst [vmem:[%s4217_s10 + $0x10] sm:$0xff] %v1999_v25  ;;  %v2084_v43 = vadd.f32 %v2628_v1, %v4214_v0  ;;  %v1382_v39 = vpop.permute.xlu1 %1381  ;;  %v1350_v5 = vpop.permute.xlu0 %1349 }
 0x27f   : > { %v2078_v50 = vpop.f32.mrf.mxu1  ;;  %v1774_v55 = vsel %vm1743_vm7, %v1741_v17, %v1382_v39  ;;  %v1758_v57 = vsel %vm1743_vm7, %v1725_v41, %v1350_v5 }
 0x280   : > { %2166 = vst [vmem:[%s4217_s10 + $0x98] sm:$0xff] %v2084_v43  ;;  %v2079_v13 = vadd.f32 %v4214_v0, %v2078_v50 }
 0x282   : > { %2165 = vst [vmem:[%s4217_s10 + $0x90] sm:$0xff] %v2079_v13  ;;  %v1384_v42 = vpop.permute.xlu1 %1383  ;;  %v1352_v36 = vpop.permute.xlu0 %1351 }
 0x283   : > { %v1775_v18 = vsel %vm1743_vm7, %v1742_v27, %v1384_v42  ;;  %v1759_v35 = vsel %vm1743_vm7, %v1726_v20, %v1352_v36 }
 0x286   : > { %v1510_v54 = vpop.permute.xlu1 %1509  ;;  %v1478_v2 = vpop.permute.xlu0 %1477 }
 0x287   : > { %v1807_v6 = vsel %vm1776_vm8, %v1774_v55, %v1510_v54  ;;  %v1791_v63 = vsel %vm1776_vm8, %v1758_v57, %v1478_v2 }
 0x288   : > { %2620 = vmatprep.mubr.msk.f32.mxu0 %vm1821_vm9, %v1791_v63  ;;  %2644 = vmatprep.mubr.msk.f32.mxu1 %vm1821_vm9, %v1807_v6 }
 0x28a   : > { %v1512_v15 = vpop.permute.xlu1 %1511  ;;  %v1480_v28 = vpop.permute.xlu0 %1479 }
 0x28b   : > { %v1808_v23 = vsel %vm1776_vm8, %v1775_v18, %v1512_v15  ;;  %v1792_v45 = vsel %vm1776_vm8, %v1759_v35, %v1480_v28 }
 0x28c   : > { %2621 = vmatmul.mubr.msk.f32.gmra.mxu0 %vm1821_vm9, %v1792_v45  ;;  %2645 = vmatmul.mubr.msk.f32.gmra.mxu1 %vm1821_vm9, %v1808_v23 }
 0x29d   : > { %v2607_v19 = vpop.f32.mrf.mxu0 }
 0x29e   : > { %v2014_v60 = vadd.f32 %v2607_v19, %v4214_v0 }
 0x29f   : > { %v2008_v58 = vpop.f32.mrf.mxu0 }
 0x2a0   : > { %2152 = vst [vmem:[%s4217_s10 + $0x28] sm:$0xff] %v2014_v60  ;;  %v2009_v4 = vadd.f32 %v4214_v0, %v2008_v58 }
 0x2a1   : > { %v2631_v14 = vpop.f32.mrf.mxu1 }
 0x2a2   : > { %2151 = vst [vmem:[%s4217_s10 + $0x20] sm:$0xff] %v2009_v4  ;;  %v2094_v44 = vadd.f32 %v2631_v14, %v4214_v0 }
 0x2a3   : > { %v2088_v24 = vpop.f32.mrf.mxu1 }
 0x2a4   : > { %2168 = vst [vmem:[%s4217_s10 + $0xa8] sm:$0xff] %v2094_v44  ;;  %v2089_v16 = vadd.f32 %v4214_v0, %v2088_v24 }
 0x2a6   : > { %2167 = vst [vmem:[%s4217_s10 + $0xa0] sm:$0xff] %v2089_v16 }
 0x2c1   : > { %v2610_v32 = vpop.f32.mrf.mxu0 }
 0x2c2   : > { %v2024_v48 = vadd.f32 %v2610_v32, %v4214_v0 }
 0x2c3   : > { %v2018_v51 = vpop.f32.mrf.mxu0 }
 0x2c4   : > { %2154 = vst [vmem:[%s4217_s10 + $0x38] sm:$0xff] %v2024_v48  ;;  %v2019_v8 = vadd.f32 %v4214_v0, %v2018_v51 }
 0x2c5   : > { %v2634_v62 = vpop.f32.mrf.mxu1 }
 0x2c6   : > { %2153 = vst [vmem:[%s4217_s10 + $0x30] sm:$0xff] %v2019_v8  ;;  %v2104_v33 = vadd.f32 %v2634_v62, %v4214_v0 }
 0x2c7   : > { %v2098_v46 = vpop.f32.mrf.mxu1 }
 0x2c8   : > { %2170 = vst [vmem:[%s4217_s10 + $0xb8] sm:$0xff] %v2104_v33  ;;  %v2099_v3 = vadd.f32 %v4214_v0, %v2098_v46 }
 0x2ca   : > { %2169 = vst [vmem:[%s4217_s10 + $0xb0] sm:$0xff] %v2099_v3 }
 0x2e4   : > { %v2613_v52 = vpop.f32.mrf.mxu0 }
 0x2e5   : > { %v2034_v12 = vadd.f32 %v2613_v52, %v4214_v0 }
 0x2e6   : > { %v2028_v38 = vpop.f32.mrf.mxu0 }
 0x2e7   : > { %2156 = vst [vmem:[%s4217_s10 + $0x48] sm:$0xff] %v2034_v12  ;;  %v2029_v29 = vadd.f32 %v4214_v0, %v2028_v38 }
 0x2e8   : > { %v2637_v40 = vpop.f32.mrf.mxu1 }
 0x2e9   : > { %2155 = vst [vmem:[%s4217_s10 + $0x40] sm:$0xff] %v2029_v29  ;;  %v2114_v22 = vadd.f32 %v2637_v40, %v4214_v0 }
 0x2ea   : > { %v2108_v53 = vpop.f32.mrf.mxu1 }
 0x2eb   : > { %2172 = vst [vmem:[%s4217_s10 + $0xc8] sm:$0xff] %v2114_v22  ;;  %v2109_v26 = vadd.f32 %v4214_v0, %v2108_v53 }
 0x2ed   : > { %2171 = vst [vmem:[%s4217_s10 + $0xc0] sm:$0xff] %v2109_v26 }
 0x308   : > { %v2616_v10 = vpop.f32.mrf.mxu0 }
 0x309   : > { %v2044_v25 = vadd.f32 %v2616_v10, %v4214_v0 }
 0x30a   : > { %v2038_v1 = vpop.f32.mrf.mxu0 }
 0x30b   : > { %2158 = vst [vmem:[%s4217_s10 + $0x58] sm:$0xff] %v2044_v25  ;;  %v2039_v43 = vadd.f32 %v4214_v0, %v2038_v1 }
 0x30c   : > { %v2640_v39 = vpop.f32.mrf.mxu1 }
 0x30d   : > { %2157 = vst [vmem:[%s4217_s10 + $0x50] sm:$0xff] %v2039_v43  ;;  %v2124_v5 = vadd.f32 %v2640_v39, %v4214_v0 }
 0x30e   : > { %v2118_v50 = vpop.f32.mrf.mxu1 }
 0x30f   : > { %2174 = vst [vmem:[%s4217_s10 + $0xd8] sm:$0xff] %v2124_v5  ;;  %v2119_v13 = vadd.f32 %v4214_v0, %v2118_v50 }
 0x311   : > { %2173 = vst [vmem:[%s4217_s10 + $0xd0] sm:$0xff] %v2119_v13 }
 0x330   : > { %v2619_v42 = vpop.f32.mrf.mxu0  ;;  %v2643_v36 = vpop.f32.mrf.mxu1 }
 0x331   : > { %v2054_v21 = vadd.f32 %v2619_v42, %v4214_v0  ;;  %v2134_v56 = vadd.f32 %v2643_v36, %v4214_v0 }
 0x332   : > { %v2048_v49 = vpop.f32.mrf.mxu0  ;;  %v2128_v61 = vpop.f32.mrf.mxu1 }
 0x333   : > { %2160 = vst [vmem:[%s4217_s10 + $0x68] sm:$0xff] %v2054_v21  ;;  %2176 = vst [vmem:[%s4217_s10 + $0xe8] sm:$0xff] %v2134_v56  ;;  %v2049_v30 = vadd.f32 %v4214_v0, %v2048_v49  ;;  %v2129_v7 = vadd.f32 %v4214_v0, %v2128_v61 }
 0x335   : > { %2159 = vst [vmem:[%s4217_s10 + $0x60] sm:$0xff] %v2049_v30  ;;  %2175 = vst [vmem:[%s4217_s10 + $0xe0] sm:$0xff] %v2129_v7 }
 0x34c   : > { %v2622_v37 = vpop.f32.mrf.mxu0  ;;  %v2646_v17 = vpop.f32.mrf.mxu1 }
 0x34d   : > { %v2064_v41 = vadd.f32 %v2622_v37, %v4214_v0  ;;  %v2144_v55 = vadd.f32 %v2646_v17, %v4214_v0 }
 0x34e   : > { %v2058_v57 = vpop.f32.mrf.mxu0  ;;  %v2138_v54 = vpop.f32.mrf.mxu1 }
 0x34f   : > { %2162 = vst [vmem:[%s4217_s10 + $0x78] sm:$0xff] %v2064_v41  ;;  %2178 = vst [vmem:[%s4217_s10 + $0xf8] sm:$0xff] %v2144_v55  ;;  %v2059_v2 = vadd.f32 %v4214_v0, %v2058_v57  ;;  %v2139_v11 = vadd.f32 %v4214_v0, %v2138_v54 }
 0x351   : > { %2161 = vst [vmem:[%s4217_s10 + $0x70] sm:$0xff] %v2059_v2  ;;  %2177 = vst [vmem:[%s4217_s10 + $0xf0] sm:$0xff] %v2139_v11 }
 0x352   : > { %2735 = shalt.err (!%p2732_p5)
}
 0x353   : > { %s2736_s4 = scalar_lea.hbm %s4345_s23, 4096  ;;  %s2740_s7 = scalar_lea.hbm %s4406_s3, 8192 }
 0x354   : > { %p2737_p6 = scmp.ne.s32.totalorder %s4345_s23, %s2736_s4  ;;  %p2741_p10 = scmp.lt.s32.totalorder %s4345_s23, %s4406_s3 }
 0x355   : > { %p2742_p11 = scmp.lt.s32.totalorder %s2740_s7, %s2736_s4 }
 0x356   : > { %p2738_p7 = pnand %p2737_p6, %p2870_p4 }
 0x357   : > { %p2743_p12 = por %p2742_p11, %p2741_p10 }
 0x358   : > { %p2739_p9 = pneg %p2738_p7 }
 0x35a   : > { %p2744_p13 = pnand %p2743_p12, %p2739_p9 }
 0x35c   : > { %2747 = shalt.err (!%p2744_p13)
}
 0x35d   : > { %s2809_s10 = smov 128  }
 0x35e   : > { %2658 = dma.vmem_to_hbm [thread:$0]  (%p2870_p4), %s4351_s18, 4096, %s4345_s23, %s4357_s15, %s2809_s10, %s2809_s10, %s2801_s5  }
 0x35f PF: > { %p2664_p0 = scmp.ge.s32.totalorder %s2798_s17, 2  ;;  %s2212_s11 = sand.u32 1, %s2778_s12  }
 0x360   : > { %s2213_s19 = scalar_lea.sflag [#allocation3], %s2212_s11 }
 0x361   : > { %p2661_p1 = pnand %p2664_p0, %p2877_p8 }
 0x363   : > { %p2662_p2 = pneg %p2661_p1 }
 0x365   : > { %2773 = dma.done.wait (%p2662_p2), %s2213_s19, 4096  }
 0x366   : > { %2775 = vsyncadd (%p2662_p2), %s2213_s19, 4294963200  ;;  %s16_s17 = sadd.s32 1, %s2798_s17   ;;  %s4564_s12 = smov %s2782_s13 }
 0x367   : > { %p13_p3 = scmp.ge.s32.totalorder %s16_s17, 4   ;;  %s4565_s13 = smov %s2786_s14 }
 0x368   : > { %s4566_s14 = smov %s2883_s25  ;;  %s4567_s15 = smov %s2794_s16 }
 0x369   : > { %s4568_s16 = smov %s4570_s20  ;;  %15 = sbr.rel (!%p13_p3) target bundleno = 4 (0x4), region = 76 }
 0x36e   :  { %2218 = vsyncpa [#allocation3], 1 }
 0x36f   :  { %2220 = vsyncpa [#allocation3 + $0x1], 1 }

</bundles_post_ra>
